<compile_context>
chip_gen: v5e
topology: v5e:2x2
jax: 0.10.0
libtpu: 0.0.40
codegen_flags: <defaults>
</compile_context>

<pallas_src>
import functools

import numpy as np
import jax
import jax.numpy as jnp
from jax.experimental import pallas as pl
from jax.experimental.pallas import tpu as pltpu

EPS = 1e-5


def _residual_block_kernel(x_ref, mask_ref, w_ref, aff_ref, o_ref, patches_ref,
                           *, n_batch, c, hw, tap_shifts):
    # x_ref / o_ref : (N, C, HW)   whole batch, one invocation
    # mask_ref      : (9, 1, HW)   0/1 validity mask per 3x3 tap (bcast over C)
    # w_ref         : (2, C, 9C)   both conv weights, im2col layout
    # aff_ref       : (4, C, 1)    [gamma1, beta1, gamma2, beta2]
    # patches_ref   : (9C, N*HW)   VMEM scratch, reused by both convs
    inv_hw = 1.0 / hw

    def build_patches(samples):
        # samples: list of N arrays of shape (C, HW).
        # 'same' 3x3 conv taps: lane rolls (XLU) + boundary masks, written
        # tap-major / sample-major into the shared patch buffer.
        for n, s in enumerate(samples):
            for t, d in enumerate(tap_shifts):
                if d == 0:                      # center tap: no roll, mask == 1
                    v = s
                else:
                    v = pltpu.roll(s, (-d) % hw, axis=1) * mask_ref[t]
                patches_ref[pl.ds(t * c, c), pl.ds(n * hw, hw)] = v

    def conv(widx):
        # single (C, 9C) @ (9C, N*HW) MXU matmul for the whole batch
        return jnp.dot(w_ref[widx], patches_ref[...],
                       preferred_element_type=jnp.float32)

    def inorm(hn, g, b):
        # per-sample, per-channel stats over HW (lane axis), biased variance,
        # two-pass form for numerical robustness.
        mean = jnp.sum(hn, axis=1, keepdims=True) * inv_hw
        d = hn - mean
        var = jnp.sum(d * d, axis=1, keepdims=True) * inv_hw
        return d * (jax.lax.rsqrt(var + EPS) * g) + b

    xs = [x_ref[n] for n in range(n_batch)]

    # conv1 -> IN1 -> ReLU
    build_patches(xs)
    h = conv(0)
    hs = [jnp.maximum(inorm(h[:, n * hw:(n + 1) * hw],
                            aff_ref[0], aff_ref[1]), 0.0)
          for n in range(n_batch)]

    # conv2 -> IN2 -> residual add
    build_patches(hs)
    h2 = conv(1)
    for n in range(n_batch):
        o_ref[n] = xs[n] + inorm(h2[:, n * hw:(n + 1) * hw],
                                 aff_ref[2], aff_ref[3])


@jax.jit
def residual_block(x_nchw, w1, g1, b1, w2, g2, b2):
    """x_nchw: (N, C, H, W) float32; conv weights in PyTorch (Cout, Cin, 3, 3)."""
    N, C, H, W = x_nchw.shape
    HW = H * W

    x = x_nchw.reshape(N, C, HW)                   # free reshape, stays "NCHW"

    # (Cout, Cin, 3, 3) -> (Cout, 3, 3, Cin) -> (Cout, 9*Cin); tap order
    # (ky, kx, cin) matches the patch-buffer row order below. Both weights
    # packed into one input.
    wk = jnp.stack([
        jnp.transpose(w1, (0, 2, 3, 1)).reshape(C, 9 * C),
        jnp.transpose(w2, (0, 2, 3, 1)).reshape(C, 9 * C)], axis=0)
    aff = jnp.stack([g1, b1, g2, b2], axis=0).reshape(4, C, 1)

    # 3x3 tap flat-index shifts and 0/1 boundary masks, built once as numpy
    # constants (no runtime XLA ops; identical for every sample/channel).
    taps = [(dy, dx) for dy in (-1, 0, 1) for dx in (-1, 0, 1)]
    fy = np.arange(HW) // W
    fx = np.arange(HW) % W
    masks = np.stack([
        (((fy + dy) >= 0) & ((fy + dy) < H) &
         ((fx + dx) >= 0) & ((fx + dx) < W)).astype(np.float32)[None, :]
        for dy, dx in taps], axis=0)               # (9, 1, HW)
    tap_shifts = tuple(dy * W + dx for dy, dx in taps)

    kernel = functools.partial(_residual_block_kernel, n_batch=N, c=C, hw=HW,
                               tap_shifts=tap_shifts)

    out = pl.pallas_call(
        kernel,
        out_shape=jax.ShapeDtypeStruct((N, C, HW), jnp.float32),
        grid_spec=pltpu.PrefetchScalarGridSpec(
            num_scalar_prefetch=0,
            grid=(1,),                              # single step: no per-step overhead
            in_specs=[
                pl.BlockSpec((N, C, HW), lambda i: (0, 0, 0)),      # x
                pl.BlockSpec((9, 1, HW), lambda i: (0, 0, 0)),      # tap masks
                pl.BlockSpec((2, C, 9 * C), lambda i: (0, 0, 0)),   # conv weights
                pl.BlockSpec((4, C, 1), lambda i: (0, 0, 0)),       # affine params
            ],
            out_specs=pl.BlockSpec((N, C, HW), lambda i: (0, 0, 0)),
            scratch_shapes=[pltpu.VMEM((9 * C, N * HW), jnp.float32)],
        ),
        compiler_params=pltpu.CompilerParams(dimension_semantics=("arbitrary",)),
    )(x, masks, wk, aff)

    return out.reshape(N, C, H, W)


def _reference(x, w1, g1, b1, w2, g2, b2):
    """Pure-JAX reference (NCHW, PyTorch conv layout) for verification."""
    def conv(h, w):
        return jax.lax.conv_general_dilated(
            h, w, window_strides=(1, 1), padding="SAME",
            dimension_numbers=("NCHW", "OIHW", "NCHW"))

    def inorm(h, g, b):
        mean = h.mean(axis=(2, 3), keepdims=True)
        var = ((h - mean) ** 2).mean(axis=(2, 3), keepdims=True)
        return ((h - mean) * jax.lax.rsqrt(var + EPS)
                * g.reshape(1, -1, 1, 1) + b.reshape(1, -1, 1, 1))

    h = conv(x, w1)
    h = inorm(h, g1, b1)
    h = jnp.maximum(h, 0.0)
    h = conv(h, w2)
    h = inorm(h, g2, b2)
    return x + h


if __name__ == "__main__":
    N, C, H, W = 2, 8, 16, 16                      # dim_in == dim_out == 8
    keys = jax.random.split(jax.random.PRNGKey(0), 7)

    x = jax.random.normal(keys[0], (N, C, H, W), jnp.float32)
    w1 = jax.random.normal(keys[1], (C, C, 3, 3), jnp.float32) * 0.1
    w2 = jax.random.normal(keys[2], (C, C, 3, 3), jnp.float32) * 0.1
    g1 = 1.0 + 0.1 * jax.random.normal(keys[3], (C,), jnp.float32)
    b1 = 0.1 * jax.random.normal(keys[4], (C,), jnp.float32)
    g2 = 1.0 + 0.1 * jax.random.normal(keys[5], (C,), jnp.float32)
    b2 = 0.1 * jax.random.normal(keys[6], (C,), jnp.float32)

    out = residual_block(x, w1, g1, b1, w2, g2, b2)
    out = jax.block_until_ready(out)

    ref = jax.block_until_ready(_reference(x, w1, g1, b1, w2, g2, b2))
    assert out.shape == (N, C, H, W)
    assert jnp.allclose(out, ref, atol=2e-3, rtol=2e-3), "mismatch vs JAX reference"

    print("KERNEL_OK")
</pallas_src>

<mosaic_0001>
module attributes {stable_mosaic.version = 11 : i64} {
  func.func @_residual_block_kernel(%arg0: i32, %arg1: memref<2x8x256xf32, #tpu.memory_space<vmem>>, %arg2: memref<9x1x256xf32, #tpu.memory_space<vmem>>, %arg3: memref<2x8x72xf32, #tpu.memory_space<vmem>>, %arg4: memref<4x8x1xf32, #tpu.memory_space<vmem>>, %arg5: memref<2x8x256xf32, #tpu.memory_space<vmem>>, %arg6: memref<72x512xf32, #tpu.memory_space<vmem>>) attributes {dimension_semantics = [#tpu.dimension_semantics<arbitrary>], iteration_bounds = array<i64: 1>, scalar_prefetch = 0 : i64, scratch_operands = 1 : i64, tpu.core_type = #tpu.core_type<tc>, window_params = [{pipeline_mode = #tpu.pipeline_mode<synchronous>, transform_indices = @transform_0, window_bounds = array<i64: 2, 8, 256>}, {pipeline_mode = #tpu.pipeline_mode<synchronous>, transform_indices = @transform_1, window_bounds = array<i64: 9, 1, 256>}, {pipeline_mode = #tpu.pipeline_mode<synchronous>, transform_indices = @transform_2, window_bounds = array<i64: 2, 8, 72>}, {pipeline_mode = #tpu.pipeline_mode<synchronous>, transform_indices = @transform_3, window_bounds = array<i64: 4, 8, 1>}, {pipeline_mode = #tpu.pipeline_mode<synchronous>, transform_indices = @transform_4, window_bounds = array<i64: 2, 8, 256>}]} {
    %c0 = arith.constant 0 : index
    %c0_0 = arith.constant 0 : index
    %c0_1 = arith.constant 0 : index
    %0 = vector.load %arg1[%c0, %c0_0, %c0_1] : memref<2x8x256xf32, #tpu.memory_space<vmem>>, vector<1x8x256xf32>
    %1 = vector.shape_cast %0 : vector<1x8x256xf32> to vector<8x256xf32>
    %c1 = arith.constant 1 : index
    %c0_2 = arith.constant 0 : index
    %c0_3 = arith.constant 0 : index
    %2 = vector.load %arg1[%c1, %c0_2, %c0_3] : memref<2x8x256xf32, #tpu.memory_space<vmem>>, vector<1x8x256xf32>
    %3 = vector.shape_cast %2 : vector<1x8x256xf32> to vector<8x256xf32>
    %c17_i32 = arith.constant 17 : i32
    %4 = tpu.dynamic_rotate %1 by %c17_i32 dim 1 : vector<8x256xf32>, i32 -> vector<8x256xf32>
    %c0_4 = arith.constant 0 : index
    %c0_5 = arith.constant 0 : index
    %c0_6 = arith.constant 0 : index
    %5 = vector.load %arg2[%c0_4, %c0_5, %c0_6] : memref<9x1x256xf32, #tpu.memory_space<vmem>>, vector<1x1x256xf32>
    %6 = vector.shape_cast %5 : vector<1x1x256xf32> to vector<1x256xf32>
    %7 = vector.broadcast %6 : vector<1x256xf32> to vector<8x256xf32>
    %8 = arith.mulf %4, %7 : vector<8x256xf32>
    %c0_7 = arith.constant 0 : index
    %c0_8 = arith.constant 0 : index
    %9 = vector.load %arg6[%c0_7, %c0_8] : memref<72x512xf32, #tpu.memory_space<vmem>>, vector<8x256xf32>
    tpu.vector_store %arg6[%c0_7, %c0_8], %8 {strides = array<i32>} : memref<72x512xf32, #tpu.memory_space<vmem>>, vector<8x256xf32>,
    %c16_i32 = arith.constant 16 : i32
    %10 = tpu.dynamic_rotate %1 by %c16_i32 dim 1 : vector<8x256xf32>, i32 -> vector<8x256xf32>
    %c1_9 = arith.constant 1 : index
    %c0_10 = arith.constant 0 : index
    %c0_11 = arith.constant 0 : index
    %11 = vector.load %arg2[%c1_9, %c0_10, %c0_11] : memref<9x1x256xf32, #tpu.memory_space<vmem>>, vector<1x1x256xf32>
    %12 = vector.shape_cast %11 : vector<1x1x256xf32> to vector<1x256xf32>
    %13 = vector.broadcast %12 : vector<1x256xf32> to vector<8x256xf32>
    %14 = arith.mulf %10, %13 : vector<8x256xf32>
    %c8 = arith.constant 8 : index
    %c0_12 = arith.constant 0 : index
    %15 = vector.load %arg6[%c8, %c0_12] : memref<72x512xf32, #tpu.memory_space<vmem>>, vector<8x256xf32>
    tpu.vector_store %arg6[%c8, %c0_12], %14 {strides = array<i32>} : memref<72x512xf32, #tpu.memory_space<vmem>>, vector<8x256xf32>,
    %c15_i32 = arith.constant 15 : i32
    %16 = tpu.dynamic_rotate %1 by %c15_i32 dim 1 : vector<8x256xf32>, i32 -> vector<8x256xf32>
    %c2 = arith.constant 2 : index
    %c0_13 = arith.constant 0 : index
    %c0_14 = arith.constant 0 : index
    %17 = vector.load %arg2[%c2, %c0_13, %c0_14] : memref<9x1x256xf32, #tpu.memory_space<vmem>>, vector<1x1x256xf32>
    %18 = vector.shape_cast %17 : vector<1x1x256xf32> to vector<1x256xf32>
    %19 = vector.broadcast %18 : vector<1x256xf32> to vector<8x256xf32>
    %20 = arith.mulf %16, %19 : vector<8x256xf32>
    %c16 = arith.constant 16 : index
    %c0_15 = arith.constant 0 : index
    %21 = vector.load %arg6[%c16, %c0_15] : memref<72x512xf32, #tpu.memory_space<vmem>>, vector<8x256xf32>
    tpu.vector_store %arg6[%c16, %c0_15], %20 {strides = array<i32>} : memref<72x512xf32, #tpu.memory_space<vmem>>, vector<8x256xf32>,
    %c1_i32 = arith.constant 1 : i32
    %22 = tpu.dynamic_rotate %1 by %c1_i32 dim 1 : vector<8x256xf32>, i32 -> vector<8x256xf32>
    %c3 = arith.constant 3 : index
    %c0_16 = arith.constant 0 : index
    %c0_17 = arith.constant 0 : index
    %23 = vector.load %arg2[%c3, %c0_16, %c0_17] : memref<9x1x256xf32, #tpu.memory_space<vmem>>, vector<1x1x256xf32>
    %24 = vector.shape_cast %23 : vector<1x1x256xf32> to vector<1x256xf32>
    %25 = vector.broadcast %24 : vector<1x256xf32> to vector<8x256xf32>
    %26 = arith.mulf %22, %25 : vector<8x256xf32>
    %c24 = arith.constant 24 : index
    %c0_18 = arith.constant 0 : index
    %27 = vector.load %arg6[%c24, %c0_18] : memref<72x512xf32, #tpu.memory_space<vmem>>, vector<8x256xf32>
    tpu.vector_store %arg6[%c24, %c0_18], %26 {strides = array<i32>} : memref<72x512xf32, #tpu.memory_space<vmem>>, vector<8x256xf32>,
    %c32 = arith.constant 32 : index
    %c0_19 = arith.constant 0 : index
    %28 = vector.load %arg6[%c32, %c0_19] : memref<72x512xf32, #tpu.memory_space<vmem>>, vector<8x256xf32>
    tpu.vector_store %arg6[%c32, %c0_19], %1 {strides = array<i32>} : memref<72x512xf32, #tpu.memory_space<vmem>>, vector<8x256xf32>,
    %c255_i32 = arith.constant 255 : i32
    %29 = tpu.dynamic_rotate %1 by %c255_i32 dim 1 : vector<8x256xf32>, i32 -> vector<8x256xf32>
    %c5 = arith.constant 5 : index
    %c0_20 = arith.constant 0 : index
    %c0_21 = arith.constant 0 : index
    %30 = vector.load %arg2[%c5, %c0_20, %c0_21] : memref<9x1x256xf32, #tpu.memory_space<vmem>>, vector<1x1x256xf32>
    %31 = vector.shape_cast %30 : vector<1x1x256xf32> to vector<1x256xf32>
    %32 = vector.broadcast %31 : vector<1x256xf32> to vector<8x256xf32>
    %33 = arith.mulf %29, %32 : vector<8x256xf32>
    %c40 = arith.constant 40 : index
    %c0_22 = arith.constant 0 : index
    %34 = vector.load %arg6[%c40, %c0_22] : memref<72x512xf32, #tpu.memory_space<vmem>>, vector<8x256xf32>
    tpu.vector_store %arg6[%c40, %c0_22], %33 {strides = array<i32>} : memref<72x512xf32, #tpu.memory_space<vmem>>, vector<8x256xf32>,
    %c241_i32 = arith.constant 241 : i32
    %35 = tpu.dynamic_rotate %1 by %c241_i32 dim 1 : vector<8x256xf32>, i32 -> vector<8x256xf32>
    %c6 = arith.constant 6 : index
    %c0_23 = arith.constant 0 : index
    %c0_24 = arith.constant 0 : index
    %36 = vector.load %arg2[%c6, %c0_23, %c0_24] : memref<9x1x256xf32, #tpu.memory_space<vmem>>, vector<1x1x256xf32>
    %37 = vector.shape_cast %36 : vector<1x1x256xf32> to vector<1x256xf32>
    %38 = vector.broadcast %37 : vector<1x256xf32> to vector<8x256xf32>
    %39 = arith.mulf %35, %38 : vector<8x256xf32>
    %c48 = arith.constant 48 : index
    %c0_25 = arith.constant 0 : index
    %40 = vector.load %arg6[%c48, %c0_25] : memref<72x512xf32, #tpu.memory_space<vmem>>, vector<8x256xf32>
    tpu.vector_store %arg6[%c48, %c0_25], %39 {strides = array<i32>} : memref<72x512xf32, #tpu.memory_space<vmem>>, vector<8x256xf32>,
    %c240_i32 = arith.constant 240 : i32
    %41 = tpu.dynamic_rotate %1 by %c240_i32 dim 1 : vector<8x256xf32>, i32 -> vector<8x256xf32>
    %c7 = arith.constant 7 : index
    %c0_26 = arith.constant 0 : index
    %c0_27 = arith.constant 0 : index
    %42 = vector.load %arg2[%c7, %c0_26, %c0_27] : memref<9x1x256xf32, #tpu.memory_space<vmem>>, vector<1x1x256xf32>
    %43 = vector.shape_cast %42 : vector<1x1x256xf32> to vector<1x256xf32>
    %44 = vector.broadcast %43 : vector<1x256xf32> to vector<8x256xf32>
    %45 = arith.mulf %41, %44 : vector<8x256xf32>
    %c56 = arith.constant 56 : index
    %c0_28 = arith.constant 0 : index
    %46 = vector.load %arg6[%c56, %c0_28] : memref<72x512xf32, #tpu.memory_space<vmem>>, vector<8x256xf32>
    tpu.vector_store %arg6[%c56, %c0_28], %45 {strides = array<i32>} : memref<72x512xf32, #tpu.memory_space<vmem>>, vector<8x256xf32>,
    %c239_i32 = arith.constant 239 : i32
    %47 = tpu.dynamic_rotate %1 by %c239_i32 dim 1 : vector<8x256xf32>, i32 -> vector<8x256xf32>
    %c8_29 = arith.constant 8 : index
    %c0_30 = arith.constant 0 : index
    %c0_31 = arith.constant 0 : index
    %48 = vector.load %arg2[%c8_29, %c0_30, %c0_31] : memref<9x1x256xf32, #tpu.memory_space<vmem>>, vector<1x1x256xf32>
    %49 = vector.shape_cast %48 : vector<1x1x256xf32> to vector<1x256xf32>
    %50 = vector.broadcast %49 : vector<1x256xf32> to vector<8x256xf32>
    %51 = arith.mulf %47, %50 : vector<8x256xf32>
    %c64 = arith.constant 64 : index
    %c0_32 = arith.constant 0 : index
    %52 = vector.load %arg6[%c64, %c0_32] : memref<72x512xf32, #tpu.memory_space<vmem>>, vector<8x256xf32>
    tpu.vector_store %arg6[%c64, %c0_32], %51 {strides = array<i32>} : memref<72x512xf32, #tpu.memory_space<vmem>>, vector<8x256xf32>,
    %c17_i32_33 = arith.constant 17 : i32
    %53 = tpu.dynamic_rotate %3 by %c17_i32_33 dim 1 : vector<8x256xf32>, i32 -> vector<8x256xf32>
    %c0_34 = arith.constant 0 : index
    %c0_35 = arith.constant 0 : index
    %c0_36 = arith.constant 0 : index
    %54 = vector.load %arg2[%c0_34, %c0_35, %c0_36] : memref<9x1x256xf32, #tpu.memory_space<vmem>>, vector<1x1x256xf32>
    %55 = vector.shape_cast %54 : vector<1x1x256xf32> to vector<1x256xf32>
    %56 = vector.broadcast %55 : vector<1x256xf32> to vector<8x256xf32>
    %57 = arith.mulf %53, %56 : vector<8x256xf32>
    %c0_37 = arith.constant 0 : index
    %c256 = arith.constant 256 : index
    %58 = vector.load %arg6[%c0_37, %c256] : memref<72x512xf32, #tpu.memory_space<vmem>>, vector<8x256xf32>
    tpu.vector_store %arg6[%c0_37, %c256], %57 {strides = array<i32>} : memref<72x512xf32, #tpu.memory_space<vmem>>, vector<8x256xf32>,
    %c16_i32_38 = arith.constant 16 : i32
    %59 = tpu.dynamic_rotate %3 by %c16_i32_38 dim 1 : vector<8x256xf32>, i32 -> vector<8x256xf32>
    %c1_39 = arith.constant 1 : index
    %c0_40 = arith.constant 0 : index
    %c0_41 = arith.constant 0 : index
    %60 = vector.load %arg2[%c1_39, %c0_40, %c0_41] : memref<9x1x256xf32, #tpu.memory_space<vmem>>, vector<1x1x256xf32>
    %61 = vector.shape_cast %60 : vector<1x1x256xf32> to vector<1x256xf32>
    %62 = vector.broadcast %61 : vector<1x256xf32> to vector<8x256xf32>
    %63 = arith.mulf %59, %62 : vector<8x256xf32>
    %c8_42 = arith.constant 8 : index
    %c256_43 = arith.constant 256 : index
    %64 = vector.load %arg6[%c8_42, %c256_43] : memref<72x512xf32, #tpu.memory_space<vmem>>, vector<8x256xf32>
    tpu.vector_store %arg6[%c8_42, %c256_43], %63 {strides = array<i32>} : memref<72x512xf32, #tpu.memory_space<vmem>>, vector<8x256xf32>,
    %c15_i32_44 = arith.constant 15 : i32
    %65 = tpu.dynamic_rotate %3 by %c15_i32_44 dim 1 : vector<8x256xf32>, i32 -> vector<8x256xf32>
    %c2_45 = arith.constant 2 : index
    %c0_46 = arith.constant 0 : index
    %c0_47 = arith.constant 0 : index
    %66 = vector.load %arg2[%c2_45, %c0_46, %c0_47] : memref<9x1x256xf32, #tpu.memory_space<vmem>>, vector<1x1x256xf32>
    %67 = vector.shape_cast %66 : vector<1x1x256xf32> to vector<1x256xf32>
    %68 = vector.broadcast %67 : vector<1x256xf32> to vector<8x256xf32>
    %69 = arith.mulf %65, %68 : vector<8x256xf32>
    %c16_48 = arith.constant 16 : index
    %c256_49 = arith.constant 256 : index
    %70 = vector.load %arg6[%c16_48, %c256_49] : memref<72x512xf32, #tpu.memory_space<vmem>>, vector<8x256xf32>
    tpu.vector_store %arg6[%c16_48, %c256_49], %69 {strides = array<i32>} : memref<72x512xf32, #tpu.memory_space<vmem>>, vector<8x256xf32>,
    %c1_i32_50 = arith.constant 1 : i32
    %71 = tpu.dynamic_rotate %3 by %c1_i32_50 dim 1 : vector<8x256xf32>, i32 -> vector<8x256xf32>
    %c3_51 = arith.constant 3 : index
    %c0_52 = arith.constant 0 : index
    %c0_53 = arith.constant 0 : index
    %72 = vector.load %arg2[%c3_51, %c0_52, %c0_53] : memref<9x1x256xf32, #tpu.memory_space<vmem>>, vector<1x1x256xf32>
    %73 = vector.shape_cast %72 : vector<1x1x256xf32> to vector<1x256xf32>
    %74 = vector.broadcast %73 : vector<1x256xf32> to vector<8x256xf32>
    %75 = arith.mulf %71, %74 : vector<8x256xf32>
    %c24_54 = arith.constant 24 : index
    %c256_55 = arith.constant 256 : index
    %76 = vector.load %arg6[%c24_54, %c256_55] : memref<72x512xf32, #tpu.memory_space<vmem>>, vector<8x256xf32>
    tpu.vector_store %arg6[%c24_54, %c256_55], %75 {strides = array<i32>} : memref<72x512xf32, #tpu.memory_space<vmem>>, vector<8x256xf32>,
    %c32_56 = arith.constant 32 : index
    %c256_57 = arith.constant 256 : index
    %77 = vector.load %arg6[%c32_56, %c256_57] : memref<72x512xf32, #tpu.memory_space<vmem>>, vector<8x256xf32>
    tpu.vector_store %arg6[%c32_56, %c256_57], %3 {strides = array<i32>} : memref<72x512xf32, #tpu.memory_space<vmem>>, vector<8x256xf32>,
    %c255_i32_58 = arith.constant 255 : i32
    %78 = tpu.dynamic_rotate %3 by %c255_i32_58 dim 1 : vector<8x256xf32>, i32 -> vector<8x256xf32>
    %c5_59 = arith.constant 5 : index
    %c0_60 = arith.constant 0 : index
    %c0_61 = arith.constant 0 : index
    %79 = vector.load %arg2[%c5_59, %c0_60, %c0_61] : memref<9x1x256xf32, #tpu.memory_space<vmem>>, vector<1x1x256xf32>
    %80 = vector.shape_cast %79 : vector<1x1x256xf32> to vector<1x256xf32>
    %81 = vector.broadcast %80 : vector<1x256xf32> to vector<8x256xf32>
    %82 = arith.mulf %78, %81 : vector<8x256xf32>
    %c40_62 = arith.constant 40 : index
    %c256_63 = arith.constant 256 : index
    %83 = vector.load %arg6[%c40_62, %c256_63] : memref<72x512xf32, #tpu.memory_space<vmem>>, vector<8x256xf32>
    tpu.vector_store %arg6[%c40_62, %c256_63], %82 {strides = array<i32>} : memref<72x512xf32, #tpu.memory_space<vmem>>, vector<8x256xf32>,
    %c241_i32_64 = arith.constant 241 : i32
    %84 = tpu.dynamic_rotate %3 by %c241_i32_64 dim 1 : vector<8x256xf32>, i32 -> vector<8x256xf32>
    %c6_65 = arith.constant 6 : index
    %c0_66 = arith.constant 0 : index
    %c0_67 = arith.constant 0 : index
    %85 = vector.load %arg2[%c6_65, %c0_66, %c0_67] : memref<9x1x256xf32, #tpu.memory_space<vmem>>, vector<1x1x256xf32>
    %86 = vector.shape_cast %85 : vector<1x1x256xf32> to vector<1x256xf32>
    %87 = vector.broadcast %86 : vector<1x256xf32> to vector<8x256xf32>
    %88 = arith.mulf %84, %87 : vector<8x256xf32>
    %c48_68 = arith.constant 48 : index
    %c256_69 = arith.constant 256 : index
    %89 = vector.load %arg6[%c48_68, %c256_69] : memref<72x512xf32, #tpu.memory_space<vmem>>, vector<8x256xf32>
    tpu.vector_store %arg6[%c48_68, %c256_69], %88 {strides = array<i32>} : memref<72x512xf32, #tpu.memory_space<vmem>>, vector<8x256xf32>,
    %c240_i32_70 = arith.constant 240 : i32
    %90 = tpu.dynamic_rotate %3 by %c240_i32_70 dim 1 : vector<8x256xf32>, i32 -> vector<8x256xf32>
    %c7_71 = arith.constant 7 : index
    %c0_72 = arith.constant 0 : index
    %c0_73 = arith.constant 0 : index
    %91 = vector.load %arg2[%c7_71, %c0_72, %c0_73] : memref<9x1x256xf32, #tpu.memory_space<vmem>>, vector<1x1x256xf32>
    %92 = vector.shape_cast %91 : vector<1x1x256xf32> to vector<1x256xf32>
    %93 = vector.broadcast %92 : vector<1x256xf32> to vector<8x256xf32>
    %94 = arith.mulf %90, %93 : vector<8x256xf32>
    %c56_74 = arith.constant 56 : index
    %c256_75 = arith.constant 256 : index
    %95 = vector.load %arg6[%c56_74, %c256_75] : memref<72x512xf32, #tpu.memory_space<vmem>>, vector<8x256xf32>
    tpu.vector_store %arg6[%c56_74, %c256_75], %94 {strides = array<i32>} : memref<72x512xf32, #tpu.memory_space<vmem>>, vector<8x256xf32>,
    %c239_i32_76 = arith.constant 239 : i32
    %96 = tpu.dynamic_rotate %3 by %c239_i32_76 dim 1 : vector<8x256xf32>, i32 -> vector<8x256xf32>
    %c8_77 = arith.constant 8 : index
    %c0_78 = arith.constant 0 : index
    %c0_79 = arith.constant 0 : index
    %97 = vector.load %arg2[%c8_77, %c0_78, %c0_79] : memref<9x1x256xf32, #tpu.memory_space<vmem>>, vector<1x1x256xf32>
    %98 = vector.shape_cast %97 : vector<1x1x256xf32> to vector<1x256xf32>
    %99 = vector.broadcast %98 : vector<1x256xf32> to vector<8x256xf32>
    %100 = arith.mulf %96, %99 : vector<8x256xf32>
    %c64_80 = arith.constant 64 : index
    %c256_81 = arith.constant 256 : index
    %101 = vector.load %arg6[%c64_80, %c256_81] : memref<72x512xf32, #tpu.memory_space<vmem>>, vector<8x256xf32>
    tpu.vector_store %arg6[%c64_80, %c256_81], %100 {strides = array<i32>} : memref<72x512xf32, #tpu.memory_space<vmem>>, vector<8x256xf32>,
    %c0_82 = arith.constant 0 : index
    %c0_83 = arith.constant 0 : index
    %c0_84 = arith.constant 0 : index
    %102 = vector.load %arg3[%c0_82, %c0_83, %c0_84] : memref<2x8x72xf32, #tpu.memory_space<vmem>>, vector<1x8x72xf32>
    %103 = vector.shape_cast %102 : vector<1x8x72xf32> to vector<8x72xf32>
    %c0_85 = arith.constant 0 : index
    %c0_86 = arith.constant 0 : index
    %104 = vector.load %arg6[%c0_85, %c0_86] : memref<72x512xf32, #tpu.memory_space<vmem>>, vector<72x512xf32>
    %cst = arith.constant dense<0.000000e+00> : vector<8x512xf32>
    %105 = tpu.matmul %103, %104, %cst {dimension_numbers = #tpu.dot_dimension_numbers<[1], [0], [0], [1], [0, 0, 1, 1], [], []>} : vector<8x72xf32>, vector<72x512xf32>, vector<8x512xf32> -> vector<8x512xf32>
    %106 = vector.extract_strided_slice %105 {offsets = [0, 0], sizes = [8, 256], strides = [1, 1]} : vector<8x512xf32> to vector<8x256xf32>
    %c0_87 = arith.constant 0 : index
    %c0_88 = arith.constant 0 : index
    %c0_89 = arith.constant 0 : index
    %107 = vector.load %arg4[%c0_87, %c0_88, %c0_89] : memref<4x8x1xf32, #tpu.memory_space<vmem>>, vector<1x8x1xf32>
    %108 = vector.shape_cast %107 : vector<1x8x1xf32> to vector<8x1xf32>
    %c1_90 = arith.constant 1 : index
    %c0_91 = arith.constant 0 : index
    %c0_92 = arith.constant 0 : index
    %109 = vector.load %arg4[%c1_90, %c0_91, %c0_92] : memref<4x8x1xf32, #tpu.memory_space<vmem>>, vector<1x8x1xf32>
    %110 = vector.shape_cast %109 : vector<1x8x1xf32> to vector<8x1xf32>
    %cst_93 = arith.constant dense<0.000000e+00> : vector<8xf32>
    %111 = vector.multi_reduction <add>, %106, %cst_93 [1] : vector<8x256xf32> to vector<8xf32>
    %112 = vector.shape_cast %111 : vector<8xf32> to vector<8x1xf32>
    %cst_94 = arith.constant 3.906250e-03 : f32
    %113 = vector.broadcast %cst_94 : f32 to vector<8x1xf32>
    %114 = arith.mulf %112, %113 : vector<8x1xf32>
    %115 = vector.broadcast %114 : vector<8x1xf32> to vector<8x256xf32>
    %116 = arith.subf %106, %115 : vector<8x256xf32>
    %117 = arith.mulf %116, %116 : vector<8x256xf32>
    %cst_95 = arith.constant dense<0.000000e+00> : vector<8xf32>
    %118 = vector.multi_reduction <add>, %117, %cst_95 [1] : vector<8x256xf32> to vector<8xf32>
    %119 = vector.shape_cast %118 : vector<8xf32> to vector<8x1xf32>
    %cst_96 = arith.constant 3.906250e-03 : f32
    %120 = vector.broadcast %cst_96 : f32 to vector<8x1xf32>
    %121 = arith.mulf %119, %120 : vector<8x1xf32>
    %cst_97 = arith.constant 9.99999974E-6 : f32
    %122 = vector.broadcast %cst_97 : f32 to vector<8x1xf32>
    %123 = arith.addf %121, %122 : vector<8x1xf32>
    %124 = math.rsqrt %123 : vector<8x1xf32>
    %125 = arith.mulf %124, %108 : vector<8x1xf32>
    %126 = vector.broadcast %125 : vector<8x1xf32> to vector<8x256xf32>
    %127 = arith.mulf %116, %126 : vector<8x256xf32>
    %128 = vector.broadcast %110 : vector<8x1xf32> to vector<8x256xf32>
    %129 = arith.addf %127, %128 : vector<8x256xf32>
    %cst_98 = arith.constant 0.000000e+00 : f32
    %130 = vector.broadcast %cst_98 : f32 to vector<8x256xf32>
    %131 = arith.maximumf %129, %130 : vector<8x256xf32>
    %132 = vector.extract_strided_slice %105 {offsets = [0, 256], sizes = [8, 256], strides = [1, 1]} : vector<8x512xf32> to vector<8x256xf32>
    %c0_99 = arith.constant 0 : index
    %c0_100 = arith.constant 0 : index
    %c0_101 = arith.constant 0 : index
    %133 = vector.load %arg4[%c0_99, %c0_100, %c0_101] : memref<4x8x1xf32, #tpu.memory_space<vmem>>, vector<1x8x1xf32>
    %134 = vector.shape_cast %133 : vector<1x8x1xf32> to vector<8x1xf32>
    %c1_102 = arith.constant 1 : index
    %c0_103 = arith.constant 0 : index
    %c0_104 = arith.constant 0 : index
    %135 = vector.load %arg4[%c1_102, %c0_103, %c0_104] : memref<4x8x1xf32, #tpu.memory_space<vmem>>, vector<1x8x1xf32>
    %136 = vector.shape_cast %135 : vector<1x8x1xf32> to vector<8x1xf32>
    %cst_105 = arith.constant dense<0.000000e+00> : vector<8xf32>
    %137 = vector.multi_reduction <add>, %132, %cst_105 [1] : vector<8x256xf32> to vector<8xf32>
    %138 = vector.shape_cast %137 : vector<8xf32> to vector<8x1xf32>
    %cst_106 = arith.constant 3.906250e-03 : f32
    %139 = vector.broadcast %cst_106 : f32 to vector<8x1xf32>
    %140 = arith.mulf %138, %139 : vector<8x1xf32>
    %141 = vector.broadcast %140 : vector<8x1xf32> to vector<8x256xf32>
    %142 = arith.subf %132, %141 : vector<8x256xf32>
    %143 = arith.mulf %142, %142 : vector<8x256xf32>
    %cst_107 = arith.constant dense<0.000000e+00> : vector<8xf32>
    %144 = vector.multi_reduction <add>, %143, %cst_107 [1] : vector<8x256xf32> to vector<8xf32>
    %145 = vector.shape_cast %144 : vector<8xf32> to vector<8x1xf32>
    %cst_108 = arith.constant 3.906250e-03 : f32
    %146 = vector.broadcast %cst_108 : f32 to vector<8x1xf32>
    %147 = arith.mulf %145, %146 : vector<8x1xf32>
    %cst_109 = arith.constant 9.99999974E-6 : f32
    %148 = vector.broadcast %cst_109 : f32 to vector<8x1xf32>
    %149 = arith.addf %147, %148 : vector<8x1xf32>
    %150 = math.rsqrt %149 : vector<8x1xf32>
    %151 = arith.mulf %150, %134 : vector<8x1xf32>
    %152 = vector.broadcast %151 : vector<8x1xf32> to vector<8x256xf32>
    %153 = arith.mulf %142, %152 : vector<8x256xf32>
    %154 = vector.broadcast %136 : vector<8x1xf32> to vector<8x256xf32>
    %155 = arith.addf %153, %154 : vector<8x256xf32>
    %cst_110 = arith.constant 0.000000e+00 : f32
    %156 = vector.broadcast %cst_110 : f32 to vector<8x256xf32>
    %157 = arith.maximumf %155, %156 : vector<8x256xf32>
    %c17_i32_111 = arith.constant 17 : i32
    %158 = tpu.dynamic_rotate %131 by %c17_i32_111 dim 1 : vector<8x256xf32>, i32 -> vector<8x256xf32>
    %c0_112 = arith.constant 0 : index
    %c0_113 = arith.constant 0 : index
    %c0_114 = arith.constant 0 : index
    %159 = vector.load %arg2[%c0_112, %c0_113, %c0_114] : memref<9x1x256xf32, #tpu.memory_space<vmem>>, vector<1x1x256xf32>
    %160 = vector.shape_cast %159 : vector<1x1x256xf32> to vector<1x256xf32>
    %161 = vector.broadcast %160 : vector<1x256xf32> to vector<8x256xf32>
    %162 = arith.mulf %158, %161 : vector<8x256xf32>
    %c0_115 = arith.constant 0 : index
    %c0_116 = arith.constant 0 : index
    %163 = vector.load %arg6[%c0_115, %c0_116] : memref<72x512xf32, #tpu.memory_space<vmem>>, vector<8x256xf32>
    tpu.vector_store %arg6[%c0_115, %c0_116], %162 {strides = array<i32>} : memref<72x512xf32, #tpu.memory_space<vmem>>, vector<8x256xf32>,
    %c16_i32_117 = arith.constant 16 : i32
    %164 = tpu.dynamic_rotate %131 by %c16_i32_117 dim 1 : vector<8x256xf32>, i32 -> vector<8x256xf32>
    %c1_118 = arith.constant 1 : index
    %c0_119 = arith.constant 0 : index
    %c0_120 = arith.constant 0 : index
    %165 = vector.load %arg2[%c1_118, %c0_119, %c0_120] : memref<9x1x256xf32, #tpu.memory_space<vmem>>, vector<1x1x256xf32>
    %166 = vector.shape_cast %165 : vector<1x1x256xf32> to vector<1x256xf32>
    %167 = vector.broadcast %166 : vector<1x256xf32> to vector<8x256xf32>
    %168 = arith.mulf %164, %167 : vector<8x256xf32>
    %c8_121 = arith.constant 8 : index
    %c0_122 = arith.constant 0 : index
    %169 = vector.load %arg6[%c8_121, %c0_122] : memref<72x512xf32, #tpu.memory_space<vmem>>, vector<8x256xf32>
    tpu.vector_store %arg6[%c8_121, %c0_122], %168 {strides = array<i32>} : memref<72x512xf32, #tpu.memory_space<vmem>>, vector<8x256xf32>,
    %c15_i32_123 = arith.constant 15 : i32
    %170 = tpu.dynamic_rotate %131 by %c15_i32_123 dim 1 : vector<8x256xf32>, i32 -> vector<8x256xf32>
    %c2_124 = arith.constant 2 : index
    %c0_125 = arith.constant 0 : index
    %c0_126 = arith.constant 0 : index
    %171 = vector.load %arg2[%c2_124, %c0_125, %c0_126] : memref<9x1x256xf32, #tpu.memory_space<vmem>>, vector<1x1x256xf32>
    %172 = vector.shape_cast %171 : vector<1x1x256xf32> to vector<1x256xf32>
    %173 = vector.broadcast %172 : vector<1x256xf32> to vector<8x256xf32>
    %174 = arith.mulf %170, %173 : vector<8x256xf32>
    %c16_127 = arith.constant 16 : index
    %c0_128 = arith.constant 0 : index
    %175 = vector.load %arg6[%c16_127, %c0_128] : memref<72x512xf32, #tpu.memory_space<vmem>>, vector<8x256xf32>
    tpu.vector_store %arg6[%c16_127, %c0_128], %174 {strides = array<i32>} : memref<72x512xf32, #tpu.memory_space<vmem>>, vector<8x256xf32>,
    %c1_i32_129 = arith.constant 1 : i32
    %176 = tpu.dynamic_rotate %131 by %c1_i32_129 dim 1 : vector<8x256xf32>, i32 -> vector<8x256xf32>
    %c3_130 = arith.constant 3 : index
    %c0_131 = arith.constant 0 : index
    %c0_132 = arith.constant 0 : index
    %177 = vector.load %arg2[%c3_130, %c0_131, %c0_132] : memref<9x1x256xf32, #tpu.memory_space<vmem>>, vector<1x1x256xf32>
    %178 = vector.shape_cast %177 : vector<1x1x256xf32> to vector<1x256xf32>
    %179 = vector.broadcast %178 : vector<1x256xf32> to vector<8x256xf32>
    %180 = arith.mulf %176, %179 : vector<8x256xf32>
    %c24_133 = arith.constant 24 : index
    %c0_134 = arith.constant 0 : index
    %181 = vector.load %arg6[%c24_133, %c0_134] : memref<72x512xf32, #tpu.memory_space<vmem>>, vector<8x256xf32>
    tpu.vector_store %arg6[%c24_133, %c0_134], %180 {strides = array<i32>} : memref<72x512xf32, #tpu.memory_space<vmem>>, vector<8x256xf32>,
    %c32_135 = arith.constant 32 : index
    %c0_136 = arith.constant 0 : index
    %182 = vector.load %arg6[%c32_135, %c0_136] : memref<72x512xf32, #tpu.memory_space<vmem>>, vector<8x256xf32>
    tpu.vector_store %arg6[%c32_135, %c0_136], %131 {strides = array<i32>} : memref<72x512xf32, #tpu.memory_space<vmem>>, vector<8x256xf32>,
    %c255_i32_137 = arith.constant 255 : i32
    %183 = tpu.dynamic_rotate %131 by %c255_i32_137 dim 1 : vector<8x256xf32>, i32 -> vector<8x256xf32>
    %c5_138 = arith.constant 5 : index
    %c0_139 = arith.constant 0 : index
    %c0_140 = arith.constant 0 : index
    %184 = vector.load %arg2[%c5_138, %c0_139, %c0_140] : memref<9x1x256xf32, #tpu.memory_space<vmem>>, vector<1x1x256xf32>
    %185 = vector.shape_cast %184 : vector<1x1x256xf32> to vector<1x256xf32>
    %186 = vector.broadcast %185 : vector<1x256xf32> to vector<8x256xf32>
    %187 = arith.mulf %183, %186 : vector<8x256xf32>
    %c40_141 = arith.constant 40 : index
    %c0_142 = arith.constant 0 : index
    %188 = vector.load %arg6[%c40_141, %c0_142] : memref<72x512xf32, #tpu.memory_space<vmem>>, vector<8x256xf32>
    tpu.vector_store %arg6[%c40_141, %c0_142], %187 {strides = array<i32>} : memref<72x512xf32, #tpu.memory_space<vmem>>, vector<8x256xf32>,
    %c241_i32_143 = arith.constant 241 : i32
    %189 = tpu.dynamic_rotate %131 by %c241_i32_143 dim 1 : vector<8x256xf32>, i32 -> vector<8x256xf32>
    %c6_144 = arith.constant 6 : index
    %c0_145 = arith.constant 0 : index
    %c0_146 = arith.constant 0 : index
    %190 = vector.load %arg2[%c6_144, %c0_145, %c0_146] : memref<9x1x256xf32, #tpu.memory_space<vmem>>, vector<1x1x256xf32>
    %191 = vector.shape_cast %190 : vector<1x1x256xf32> to vector<1x256xf32>
    %192 = vector.broadcast %191 : vector<1x256xf32> to vector<8x256xf32>
    %193 = arith.mulf %189, %192 : vector<8x256xf32>
    %c48_147 = arith.constant 48 : index
    %c0_148 = arith.constant 0 : index
    %194 = vector.load %arg6[%c48_147, %c0_148] : memref<72x512xf32, #tpu.memory_space<vmem>>, vector<8x256xf32>
    tpu.vector_store %arg6[%c48_147, %c0_148], %193 {strides = array<i32>} : memref<72x512xf32, #tpu.memory_space<vmem>>, vector<8x256xf32>,
    %c240_i32_149 = arith.constant 240 : i32
    %195 = tpu.dynamic_rotate %131 by %c240_i32_149 dim 1 : vector<8x256xf32>, i32 -> vector<8x256xf32>
    %c7_150 = arith.constant 7 : index
    %c0_151 = arith.constant 0 : index
    %c0_152 = arith.constant 0 : index
    %196 = vector.load %arg2[%c7_150, %c0_151, %c0_152] : memref<9x1x256xf32, #tpu.memory_space<vmem>>, vector<1x1x256xf32>
    %197 = vector.shape_cast %196 : vector<1x1x256xf32> to vector<1x256xf32>
    %198 = vector.broadcast %197 : vector<1x256xf32> to vector<8x256xf32>
    %199 = arith.mulf %195, %198 : vector<8x256xf32>
    %c56_153 = arith.constant 56 : index
    %c0_154 = arith.constant 0 : index
    %200 = vector.load %arg6[%c56_153, %c0_154] : memref<72x512xf32, #tpu.memory_space<vmem>>, vector<8x256xf32>
    tpu.vector_store %arg6[%c56_153, %c0_154], %199 {strides = array<i32>} : memref<72x512xf32, #tpu.memory_space<vmem>>, vector<8x256xf32>,
    %c239_i32_155 = arith.constant 239 : i32
    %201 = tpu.dynamic_rotate %131 by %c239_i32_155 dim 1 : vector<8x256xf32>, i32 -> vector<8x256xf32>
    %c8_156 = arith.constant 8 : index
    %c0_157 = arith.constant 0 : index
    %c0_158 = arith.constant 0 : index
    %202 = vector.load %arg2[%c8_156, %c0_157, %c0_158] : memref<9x1x256xf32, #tpu.memory_space<vmem>>, vector<1x1x256xf32>
    %203 = vector.shape_cast %202 : vector<1x1x256xf32> to vector<1x256xf32>
    %204 = vector.broadcast %203 : vector<1x256xf32> to vector<8x256xf32>
    %205 = arith.mulf %201, %204 : vector<8x256xf32>
    %c64_159 = arith.constant 64 : index
    %c0_160 = arith.constant 0 : index
    %206 = vector.load %arg6[%c64_159, %c0_160] : memref<72x512xf32, #tpu.memory_space<vmem>>, vector<8x256xf32>
    tpu.vector_store %arg6[%c64_159, %c0_160], %205 {strides = array<i32>} : memref<72x512xf32, #tpu.memory_space<vmem>>, vector<8x256xf32>,
    %c17_i32_161 = arith.constant 17 : i32
    %207 = tpu.dynamic_rotate %157 by %c17_i32_161 dim 1 : vector<8x256xf32>, i32 -> vector<8x256xf32>
    %c0_162 = arith.constant 0 : index
    %c0_163 = arith.constant 0 : index
    %c0_164 = arith.constant 0 : index
    %208 = vector.load %arg2[%c0_162, %c0_163, %c0_164] : memref<9x1x256xf32, #tpu.memory_space<vmem>>, vector<1x1x256xf32>
    %209 = vector.shape_cast %208 : vector<1x1x256xf32> to vector<1x256xf32>
    %210 = vector.broadcast %209 : vector<1x256xf32> to vector<8x256xf32>
    %211 = arith.mulf %207, %210 : vector<8x256xf32>
    %c0_165 = arith.constant 0 : index
    %c256_166 = arith.constant 256 : index
    %212 = vector.load %arg6[%c0_165, %c256_166] : memref<72x512xf32, #tpu.memory_space<vmem>>, vector<8x256xf32>
    tpu.vector_store %arg6[%c0_165, %c256_166], %211 {strides = array<i32>} : memref<72x512xf32, #tpu.memory_space<vmem>>, vector<8x256xf32>,
    %c16_i32_167 = arith.constant 16 : i32
    %213 = tpu.dynamic_rotate %157 by %c16_i32_167 dim 1 : vector<8x256xf32>, i32 -> vector<8x256xf32>
    %c1_168 = arith.constant 1 : index
    %c0_169 = arith.constant 0 : index
    %c0_170 = arith.constant 0 : index
    %214 = vector.load %arg2[%c1_168, %c0_169, %c0_170] : memref<9x1x256xf32, #tpu.memory_space<vmem>>, vector<1x1x256xf32>
    %215 = vector.shape_cast %214 : vector<1x1x256xf32> to vector<1x256xf32>
    %216 = vector.broadcast %215 : vector<1x256xf32> to vector<8x256xf32>
    %217 = arith.mulf %213, %216 : vector<8x256xf32>
    %c8_171 = arith.constant 8 : index
    %c256_172 = arith.constant 256 : index
    %218 = vector.load %arg6[%c8_171, %c256_172] : memref<72x512xf32, #tpu.memory_space<vmem>>, vector<8x256xf32>
    tpu.vector_store %arg6[%c8_171, %c256_172], %217 {strides = array<i32>} : memref<72x512xf32, #tpu.memory_space<vmem>>, vector<8x256xf32>,
    %c15_i32_173 = arith.constant 15 : i32
    %219 = tpu.dynamic_rotate %157 by %c15_i32_173 dim 1 : vector<8x256xf32>, i32 -> vector<8x256xf32>
    %c2_174 = arith.constant 2 : index
    %c0_175 = arith.constant 0 : index
    %c0_176 = arith.constant 0 : index
    %220 = vector.load %arg2[%c2_174, %c0_175, %c0_176] : memref<9x1x256xf32, #tpu.memory_space<vmem>>, vector<1x1x256xf32>
    %221 = vector.shape_cast %220 : vector<1x1x256xf32> to vector<1x256xf32>
    %222 = vector.broadcast %221 : vector<1x256xf32> to vector<8x256xf32>
    %223 = arith.mulf %219, %222 : vector<8x256xf32>
    %c16_177 = arith.constant 16 : index
    %c256_178 = arith.constant 256 : index
    %224 = vector.load %arg6[%c16_177, %c256_178] : memref<72x512xf32, #tpu.memory_space<vmem>>, vector<8x256xf32>
    tpu.vector_store %arg6[%c16_177, %c256_178], %223 {strides = array<i32>} : memref<72x512xf32, #tpu.memory_space<vmem>>, vector<8x256xf32>,
    %c1_i32_179 = arith.constant 1 : i32
    %225 = tpu.dynamic_rotate %157 by %c1_i32_179 dim 1 : vector<8x256xf32>, i32 -> vector<8x256xf32>
    %c3_180 = arith.constant 3 : index
    %c0_181 = arith.constant 0 : index
    %c0_182 = arith.constant 0 : index
    %226 = vector.load %arg2[%c3_180, %c0_181, %c0_182] : memref<9x1x256xf32, #tpu.memory_space<vmem>>, vector<1x1x256xf32>
    %227 = vector.shape_cast %226 : vector<1x1x256xf32> to vector<1x256xf32>
    %228 = vector.broadcast %227 : vector<1x256xf32> to vector<8x256xf32>
    %229 = arith.mulf %225, %228 : vector<8x256xf32>
    %c24_183 = arith.constant 24 : index
    %c256_184 = arith.constant 256 : index
    %230 = vector.load %arg6[%c24_183, %c256_184] : memref<72x512xf32, #tpu.memory_space<vmem>>, vector<8x256xf32>
    tpu.vector_store %arg6[%c24_183, %c256_184], %229 {strides = array<i32>} : memref<72x512xf32, #tpu.memory_space<vmem>>, vector<8x256xf32>,
    %c32_185 = arith.constant 32 : index
    %c256_186 = arith.constant 256 : index
    %231 = vector.load %arg6[%c32_185, %c256_186] : memref<72x512xf32, #tpu.memory_space<vmem>>, vector<8x256xf32>
    tpu.vector_store %arg6[%c32_185, %c256_186], %157 {strides = array<i32>} : memref<72x512xf32, #tpu.memory_space<vmem>>, vector<8x256xf32>,
    %c255_i32_187 = arith.constant 255 : i32
    %232 = tpu.dynamic_rotate %157 by %c255_i32_187 dim 1 : vector<8x256xf32>, i32 -> vector<8x256xf32>
    %c5_188 = arith.constant 5 : index
    %c0_189 = arith.constant 0 : index
    %c0_190 = arith.constant 0 : index
    %233 = vector.load %arg2[%c5_188, %c0_189, %c0_190] : memref<9x1x256xf32, #tpu.memory_space<vmem>>, vector<1x1x256xf32>
    %234 = vector.shape_cast %233 : vector<1x1x256xf32> to vector<1x256xf32>
    %235 = vector.broadcast %234 : vector<1x256xf32> to vector<8x256xf32>
    %236 = arith.mulf %232, %235 : vector<8x256xf32>
    %c40_191 = arith.constant 40 : index
    %c256_192 = arith.constant 256 : index
    %237 = vector.load %arg6[%c40_191, %c256_192] : memref<72x512xf32, #tpu.memory_space<vmem>>, vector<8x256xf32>
    tpu.vector_store %arg6[%c40_191, %c256_192], %236 {strides = array<i32>} : memref<72x512xf32, #tpu.memory_space<vmem>>, vector<8x256xf32>,
    %c241_i32_193 = arith.constant 241 : i32
    %238 = tpu.dynamic_rotate %157 by %c241_i32_193 dim 1 : vector<8x256xf32>, i32 -> vector<8x256xf32>
    %c6_194 = arith.constant 6 : index
    %c0_195 = arith.constant 0 : index
    %c0_196 = arith.constant 0 : index
    %239 = vector.load %arg2[%c6_194, %c0_195, %c0_196] : memref<9x1x256xf32, #tpu.memory_space<vmem>>, vector<1x1x256xf32>
    %240 = vector.shape_cast %239 : vector<1x1x256xf32> to vector<1x256xf32>
    %241 = vector.broadcast %240 : vector<1x256xf32> to vector<8x256xf32>
    %242 = arith.mulf %238, %241 : vector<8x256xf32>
    %c48_197 = arith.constant 48 : index
    %c256_198 = arith.constant 256 : index
    %243 = vector.load %arg6[%c48_197, %c256_198] : memref<72x512xf32, #tpu.memory_space<vmem>>, vector<8x256xf32>
    tpu.vector_store %arg6[%c48_197, %c256_198], %242 {strides = array<i32>} : memref<72x512xf32, #tpu.memory_space<vmem>>, vector<8x256xf32>,
    %c240_i32_199 = arith.constant 240 : i32
    %244 = tpu.dynamic_rotate %157 by %c240_i32_199 dim 1 : vector<8x256xf32>, i32 -> vector<8x256xf32>
    %c7_200 = arith.constant 7 : index
    %c0_201 = arith.constant 0 : index
    %c0_202 = arith.constant 0 : index
    %245 = vector.load %arg2[%c7_200, %c0_201, %c0_202] : memref<9x1x256xf32, #tpu.memory_space<vmem>>, vector<1x1x256xf32>
    %246 = vector.shape_cast %245 : vector<1x1x256xf32> to vector<1x256xf32>
    %247 = vector.broadcast %246 : vector<1x256xf32> to vector<8x256xf32>
    %248 = arith.mulf %244, %247 : vector<8x256xf32>
    %c56_203 = arith.constant 56 : index
    %c256_204 = arith.constant 256 : index
    %249 = vector.load %arg6[%c56_203, %c256_204] : memref<72x512xf32, #tpu.memory_space<vmem>>, vector<8x256xf32>
    tpu.vector_store %arg6[%c56_203, %c256_204], %248 {strides = array<i32>} : memref<72x512xf32, #tpu.memory_space<vmem>>, vector<8x256xf32>,
    %c239_i32_205 = arith.constant 239 : i32
    %250 = tpu.dynamic_rotate %157 by %c239_i32_205 dim 1 : vector<8x256xf32>, i32 -> vector<8x256xf32>
    %c8_206 = arith.constant 8 : index
    %c0_207 = arith.constant 0 : index
    %c0_208 = arith.constant 0 : index
    %251 = vector.load %arg2[%c8_206, %c0_207, %c0_208] : memref<9x1x256xf32, #tpu.memory_space<vmem>>, vector<1x1x256xf32>
    %252 = vector.shape_cast %251 : vector<1x1x256xf32> to vector<1x256xf32>
    %253 = vector.broadcast %252 : vector<1x256xf32> to vector<8x256xf32>
    %254 = arith.mulf %250, %253 : vector<8x256xf32>
    %c64_209 = arith.constant 64 : index
    %c256_210 = arith.constant 256 : index
    %255 = vector.load %arg6[%c64_209, %c256_210] : memref<72x512xf32, #tpu.memory_space<vmem>>, vector<8x256xf32>
    tpu.vector_store %arg6[%c64_209, %c256_210], %254 {strides = array<i32>} : memref<72x512xf32, #tpu.memory_space<vmem>>, vector<8x256xf32>,
    %c1_211 = arith.constant 1 : index
    %c0_212 = arith.constant 0 : index
    %c0_213 = arith.constant 0 : index
    %256 = vector.load %arg3[%c1_211, %c0_212, %c0_213] : memref<2x8x72xf32, #tpu.memory_space<vmem>>, vector<1x8x72xf32>
    %257 = vector.shape_cast %256 : vector<1x8x72xf32> to vector<8x72xf32>
    %c0_214 = arith.constant 0 : index
    %c0_215 = arith.constant 0 : index
    %258 = vector.load %arg6[%c0_214, %c0_215] : memref<72x512xf32, #tpu.memory_space<vmem>>, vector<72x512xf32>
    %cst_216 = arith.constant dense<0.000000e+00> : vector<8x512xf32>
    %259 = tpu.matmul %257, %258, %cst_216 {dimension_numbers = #tpu.dot_dimension_numbers<[1], [0], [0], [1], [0, 0, 1, 1], [], []>} : vector<8x72xf32>, vector<72x512xf32>, vector<8x512xf32> -> vector<8x512xf32>
    %260 = vector.extract_strided_slice %259 {offsets = [0, 0], sizes = [8, 256], strides = [1, 1]} : vector<8x512xf32> to vector<8x256xf32>
    %c2_217 = arith.constant 2 : index
    %c0_218 = arith.constant 0 : index
    %c0_219 = arith.constant 0 : index
    %261 = vector.load %arg4[%c2_217, %c0_218, %c0_219] : memref<4x8x1xf32, #tpu.memory_space<vmem>>, vector<1x8x1xf32>
    %262 = vector.shape_cast %261 : vector<1x8x1xf32> to vector<8x1xf32>
    %c3_220 = arith.constant 3 : index
    %c0_221 = arith.constant 0 : index
    %c0_222 = arith.constant 0 : index
    %263 = vector.load %arg4[%c3_220, %c0_221, %c0_222] : memref<4x8x1xf32, #tpu.memory_space<vmem>>, vector<1x8x1xf32>
    %264 = vector.shape_cast %263 : vector<1x8x1xf32> to vector<8x1xf32>
    %cst_223 = arith.constant dense<0.000000e+00> : vector<8xf32>
    %265 = vector.multi_reduction <add>, %260, %cst_223 [1] : vector<8x256xf32> to vector<8xf32>
    %266 = vector.shape_cast %265 : vector<8xf32> to vector<8x1xf32>
    %cst_224 = arith.constant 3.906250e-03 : f32
    %267 = vector.broadcast %cst_224 : f32 to vector<8x1xf32>
    %268 = arith.mulf %266, %267 : vector<8x1xf32>
    %269 = vector.broadcast %268 : vector<8x1xf32> to vector<8x256xf32>
    %270 = arith.subf %260, %269 : vector<8x256xf32>
    %271 = arith.mulf %270, %270 : vector<8x256xf32>
    %cst_225 = arith.constant dense<0.000000e+00> : vector<8xf32>
    %272 = vector.multi_reduction <add>, %271, %cst_225 [1] : vector<8x256xf32> to vector<8xf32>
    %273 = vector.shape_cast %272 : vector<8xf32> to vector<8x1xf32>
    %cst_226 = arith.constant 3.906250e-03 : f32
    %274 = vector.broadcast %cst_226 : f32 to vector<8x1xf32>
    %275 = arith.mulf %273, %274 : vector<8x1xf32>
    %cst_227 = arith.constant 9.99999974E-6 : f32
    %276 = vector.broadcast %cst_227 : f32 to vector<8x1xf32>
    %277 = arith.addf %275, %276 : vector<8x1xf32>
    %278 = math.rsqrt %277 : vector<8x1xf32>
    %279 = arith.mulf %278, %262 : vector<8x1xf32>
    %280 = vector.broadcast %279 : vector<8x1xf32> to vector<8x256xf32>
    %281 = arith.mulf %270, %280 : vector<8x256xf32>
    %282 = vector.broadcast %264 : vector<8x1xf32> to vector<8x256xf32>
    %283 = arith.addf %281, %282 : vector<8x256xf32>
    %284 = arith.addf %1, %283 : vector<8x256xf32>
    %c0_228 = arith.constant 0 : index
    %c0_229 = arith.constant 0 : index
    %c0_230 = arith.constant 0 : index
    %285 = vector.load %arg5[%c0_228, %c0_229, %c0_230] : memref<2x8x256xf32, #tpu.memory_space<vmem>>, vector<1x8x256xf32>
    %286 = vector.shape_cast %285 : vector<1x8x256xf32> to vector<8x256xf32>
    %287 = vector.shape_cast %284 : vector<8x256xf32> to vector<1x8x256xf32>
    tpu.vector_store %arg5[%c0_228, %c0_229, %c0_230], %287 {strides = array<i32>} : memref<2x8x256xf32, #tpu.memory_space<vmem>>, vector<1x8x256xf32>,
    %288 = vector.extract_strided_slice %259 {offsets = [0, 256], sizes = [8, 256], strides = [1, 1]} : vector<8x512xf32> to vector<8x256xf32>
    %c2_231 = arith.constant 2 : index
    %c0_232 = arith.constant 0 : index
    %c0_233 = arith.constant 0 : index
    %289 = vector.load %arg4[%c2_231, %c0_232, %c0_233] : memref<4x8x1xf32, #tpu.memory_space<vmem>>, vector<1x8x1xf32>
    %290 = vector.shape_cast %289 : vector<1x8x1xf32> to vector<8x1xf32>
    %c3_234 = arith.constant 3 : index
    %c0_235 = arith.constant 0 : index
    %c0_236 = arith.constant 0 : index
    %291 = vector.load %arg4[%c3_234, %c0_235, %c0_236] : memref<4x8x1xf32, #tpu.memory_space<vmem>>, vector<1x8x1xf32>
    %292 = vector.shape_cast %291 : vector<1x8x1xf32> to vector<8x1xf32>
    %cst_237 = arith.constant dense<0.000000e+00> : vector<8xf32>
    %293 = vector.multi_reduction <add>, %288, %cst_237 [1] : vector<8x256xf32> to vector<8xf32>
    %294 = vector.shape_cast %293 : vector<8xf32> to vector<8x1xf32>
    %cst_238 = arith.constant 3.906250e-03 : f32
    %295 = vector.broadcast %cst_238 : f32 to vector<8x1xf32>
    %296 = arith.mulf %294, %295 : vector<8x1xf32>
    %297 = vector.broadcast %296 : vector<8x1xf32> to vector<8x256xf32>
    %298 = arith.subf %288, %297 : vector<8x256xf32>
    %299 = arith.mulf %298, %298 : vector<8x256xf32>
    %cst_239 = arith.constant dense<0.000000e+00> : vector<8xf32>
    %300 = vector.multi_reduction <add>, %299, %cst_239 [1] : vector<8x256xf32> to vector<8xf32>
    %301 = vector.shape_cast %300 : vector<8xf32> to vector<8x1xf32>
    %cst_240 = arith.constant 3.906250e-03 : f32
    %302 = vector.broadcast %cst_240 : f32 to vector<8x1xf32>
    %303 = arith.mulf %301, %302 : vector<8x1xf32>
    %cst_241 = arith.constant 9.99999974E-6 : f32
    %304 = vector.broadcast %cst_241 : f32 to vector<8x1xf32>
    %305 = arith.addf %303, %304 : vector<8x1xf32>
    %306 = math.rsqrt %305 : vector<8x1xf32>
    %307 = arith.mulf %306, %290 : vector<8x1xf32>
    %308 = vector.broadcast %307 : vector<8x1xf32> to vector<8x256xf32>
    %309 = arith.mulf %298, %308 : vector<8x256xf32>
    %310 = vector.broadcast %292 : vector<8x1xf32> to vector<8x256xf32>
    %311 = arith.addf %309, %310 : vector<8x256xf32>
    %312 = arith.addf %3, %311 : vector<8x256xf32>
    %c1_242 = arith.constant 1 : index
    %c0_243 = arith.constant 0 : index
    %c0_244 = arith.constant 0 : index
    %313 = vector.load %arg5[%c1_242, %c0_243, %c0_244] : memref<2x8x256xf32, #tpu.memory_space<vmem>>, vector<1x8x256xf32>
    %314 = vector.shape_cast %313 : vector<1x8x256xf32> to vector<8x256xf32>
    %315 = vector.shape_cast %312 : vector<8x256xf32> to vector<1x8x256xf32>
    tpu.vector_store %arg5[%c1_242, %c0_243, %c0_244], %315 {strides = array<i32>} : memref<2x8x256xf32, #tpu.memory_space<vmem>>, vector<1x8x256xf32>,
    return
  }
  func.func @transform_0(%arg0: i32) -> (i32, i32, i32) {
    %c0_i32 = arith.constant 0 : i32
    %c0_i32_0 = arith.constant 0 : i32
    %c0_i32_1 = arith.constant 0 : i32
    %c0_i32_2 = arith.constant 0 : i32
    return %c0_i32, %c0_i32_0, %c0_i32_1 : i32, i32, i32
  }
  func.func @transform_1(%arg0: i32) -> (i32, i32, i32) {
    %c0_i32 = arith.constant 0 : i32
    %c0_i32_0 = arith.constant 0 : i32
    %c0_i32_1 = arith.constant 0 : i32
    %c0_i32_2 = arith.constant 0 : i32
    return %c0_i32, %c0_i32_0, %c0_i32_1 : i32, i32, i32
  }
  func.func @transform_2(%arg0: i32) -> (i32, i32, i32) {
    %c0_i32 = arith.constant 0 : i32
    %c0_i32_0 = arith.constant 0 : i32
    %c0_i32_1 = arith.constant 0 : i32
    %c0_i32_2 = arith.constant 0 : i32
    return %c0_i32, %c0_i32_0, %c0_i32_1 : i32, i32, i32
  }
  func.func @transform_3(%arg0: i32) -> (i32, i32, i32) {
    %c0_i32 = arith.constant 0 : i32
    %c0_i32_0 = arith.constant 0 : i32
    %c0_i32_1 = arith.constant 0 : i32
    %c0_i32_2 = arith.constant 0 : i32
    return %c0_i32, %c0_i32_0, %c0_i32_1 : i32, i32, i32
  }
  func.func @transform_4(%arg0: i32) -> (i32, i32, i32) {
    %c0_i32 = arith.constant 0 : i32
    %c0_i32_0 = arith.constant 0 : i32
    %c0_i32_1 = arith.constant 0 : i32
    %c0_i32_2 = arith.constant 0 : i32
    return %c0_i32, %c0_i32_0, %c0_i32_1 : i32, i32, i32
  }
}

</mosaic_0001>

<bundles_post_ra>
// kernel: residual_block.1
= control target key start
LH: loop header
LB: loop body
LE: loop exit
PB: predicated region body
PF: predicated region fallthrough
CT: control target
= control target key end

     0   :  { %s1044_s17 = smov 112   ;;  %s1045_s18 = smov 111   ;;  %v26_v9 = vlaneseq  ;;  %vm336_vm8 = vcmask 588800   ;;  %s1544_s0 = inlined_call_operand.vmem [shape: f32[2,8,256], index: 0, kind: input, shape index: {}]   ;;  %s1545_s1 = inlined_call_operand.vmem [shape: f32[9,1,256], index: 1, kind: input, shape index: {}]   ;;  %s1546_s2 = inlined_call_operand.vmem [shape: f32[2,8,72], index: 2, kind: input, shape index: {}]   ;;  %s1547_s3 = inlined_call_operand.vmem [shape: f32[4,8,1], index: 3, kind: input, shape index: {}]   ;;  %s1548_s4 = inlined_call_operand.vmem [shape: f32[2,8,256], index: 4, kind: output, shape index: {}]  }
   0x1   :  { %v1081_v0 = vld [vmem:[%s1544_s0 + $0x10] sm:$0xff]  ;;  %s1046_s19 = smov 113   ;;  %v1092_v1 = vld [vmem:[%s1544_s0 + $0x18] sm:$0xff]  ;;  %s1047_s22 = smov 127   ;;  %v1109_v2 = vld [vmem:[%s1544_s0] sm:$0xff] }
   0x2   :  { %267 = vrot.lane.b32.xlu1 %v1081_v0, %s1044_s17  ;;  %283 = vrot.lane.b32.xlu0 %v1081_v0, %s1045_s18  ;;  %s1048_s23 = smov 1   ;;  %v1118_v3 = vld [vmem:[%s1544_s0 + $0x8] sm:$0xff]  ;;  %s1049_s28 = smov 15   ;;  %v989_v10 = vld [vmem:[%s1545_s1 + $0x10] sm:$0x3]  ;;  %v1167_v11 = vand.u32 127, %v26_v9 }
   0x3   :  { %251 = vrot.lane.b32.xlu2 %v1081_v0, %s1046_s19  ;;  %s1050_s29 = smov 16   ;;  %s1051_s30 = smov 17   ;;  %v988_v12 = vld [vmem:[%s1545_s1 + $0xe] sm:$0x3]  ;;  %v291_v13 = vperm.slane %v989_v10, 0  ;;  %v292_v14 = vperm.slane %v989_v10, 1 }
   0x4   :  { %vm137_vm0 = vcmp.lt.s32.totalorder %v1167_v11, 112  ;;  %vm155_vm1 = vcmp.lt.s32.totalorder %v1167_v11, 111  ;;  %v987_v15 = vld [vmem:[%s1545_s1 + $0xc] sm:$0x3]  ;;  %vm119_vm2 = vcmp.lt.s32.totalorder %v1167_v11, 113  ;;  %v275_v18 = vperm.slane %v988_v12, 0 }
   0x5   :  { %v276_v19 = vperm.slane %v988_v12, 1  ;;  %v259_v27 = vperm.slane %v987_v15, 0  ;;  %v260_v28 = vperm.slane %v987_v15, 1  ;;  %v986_v31 = vld [vmem:[%s1545_s1 + $0xa] sm:$0x3]  ;;  %vm101_vm3 = vcmp.lt.s32.totalorder %v1167_v11, 127 }
   0x6   :  { %v243_v36 = vperm.slane %v986_v31, 0  ;;  %v244_v37 = vperm.slane %v986_v31, 1  ;;  %v982_v44 = vld [vmem:[%s1545_s1 + $0x10] sm:$0x3]  ;;  %v985_v45 = vld [vmem:[%s1545_s1 + $0x6] sm:$0x3] }
   0x7   :  { %vm81_vm4 = vcmp.lt.s32.totalorder %v1167_v11, 1  ;;  %v161_v47 = vperm.slane %v982_v44, 0  ;;  %v162_v48 = vperm.slane %v982_v44, 1  ;;  %v225_v49 = vperm.slane %v985_v45, 0  ;;  %v984_v61 = vld [vmem:[%s1545_s1 + $0x4] sm:$0x3] }
   0x8   :  { %v226_v50 = vperm.slane %v985_v45, 1  ;;  %vm63_vm5 = vcmp.lt.s32.totalorder %v1167_v11, 15  ;;  %v209_v63 = vperm.slane %v984_v61, 0  ;;  %v981_v9 = vld [vmem:[%s1545_s1 + $0xe] sm:$0x3]  ;;  %vm45_vm6 = vcmp.lt.s32.totalorder %v1167_v11, 16 }
   0x9   :  { %v983_v10 = vld [vmem:[%s1545_s1 + $0x2] sm:$0x3]  ;;  %v143_v12 = vperm.slane %v981_v9, 0  ;;  %vm28_vm7 = vcmp.lt.s32.totalorder %v1167_v11, 17 }
   0xa   :  { %269 = vrot.lane.b32.xlu1 %v1092_v1, %s1044_s17  ;;  %285 = vrot.lane.b32.xlu0 %v1092_v1, %s1045_s18  ;;  %v194_v15 = vperm.slane %v983_v10, 1 }
   0xb   :  { %253 = vrot.lane.b32.xlu2 %v1092_v1, %s1046_s19 }
  0x12   :  { %237 = vrot.lane.b32.xlu1 %v1092_v1, %s1047_s22  ;;  %235 = vrot.lane.b32.xlu0 %v1081_v0, %s1047_s22 }
  0x13   :  { %217 = vrot.lane.b32.xlu2 %v1081_v0, %s1048_s23 }
  0x1a   :  { %219 = vrot.lane.b32.xlu0 %v1092_v1, %s1048_s23  ;;  %151 = vrot.lane.b32.xlu1 %v1109_v2, %s1045_s18 }
  0x1b   :  { %153 = vrot.lane.b32.xlu2 %v1118_v3, %s1045_s18 }
  0x22   :  { %201 = vrot.lane.b32.xlu0 %v1081_v0, %s1049_s28  ;;  %203 = vrot.lane.b32.xlu1 %v1092_v1, %s1049_s28 }
  0x23   :  { %133 = vrot.lane.b32.xlu2 %v1109_v2, %s1044_s17 }
  0x2a   :  { %135 = vrot.lane.b32.xlu0 %v1118_v3, %s1044_s17  ;;  %185 = vrot.lane.b32.xlu1 %v1081_v0, %s1050_s29 }
  0x2b   :  { %187 = vrot.lane.b32.xlu2 %v1092_v1, %s1050_s29 }
  0x32   :  { %115 = vrot.lane.b32.xlu0 %v1109_v2, %s1046_s19  ;;  %117 = vrot.lane.b32.xlu1 %v1118_v3, %s1046_s19 }
  0x33   :  { %169 = vrot.lane.b32.xlu2 %v1081_v0, %s1051_s30 }
  0x3a   :  { %171 = vrot.lane.b32.xlu0 %v1092_v1, %s1051_s30  ;;  %97 = vrot.lane.b32.xlu1 %v1109_v2, %s1047_s22 }
  0x3b   :  { %99 = vrot.lane.b32.xlu2 %v1118_v3, %s1047_s22 }
  0x42   :  { %77 = vrot.lane.b32.xlu0 %v1109_v2, %s1048_s23  ;;  %79 = vrot.lane.b32.xlu1 %v1118_v3, %s1048_s23 }
  0x43   :  { %59 = vrot.lane.b32.xlu2 %v1109_v2, %s1049_s28 }
  0x4a   :  { %61 = vrot.lane.b32.xlu0 %v1118_v3, %s1049_s28  ;;  %41 = vrot.lane.b32.xlu1 %v1109_v2, %s1050_s29 }
  0x4b   :  { %43 = vrot.lane.b32.xlu2 %v1118_v3, %s1050_s29 }
  0x52   :  { %22 = vrot.lane.b32.xlu0 %v1109_v2, %s1051_s30  ;;  %24 = vrot.lane.b32.xlu1 %v1118_v3, %s1051_s30 }
  0x5d   :  { %v252_v4 = vpop.permute.xlu2 %251 }
  0x65   :  { %v254_v5 = vpop.permute.xlu2 %253 }
  0x66   :  { %v255_v29 = vsel %vm119_vm2, %v252_v4, %v254_v5  ;;  %v256_v30 = vsel %vm119_vm2, %v254_v5, %v252_v4 }
  0x67   :  { %v263_v34 = vmul.f32 %v259_v27, %v255_v29  ;;  %v264_v35 = vmul.f32 %v260_v28, %v256_v30  ;;  %v980_v27 = vld [vmem:[%s1545_s1 + $0xc] sm:$0x3] }
  0x68   :  { %v125_v28 = vperm.slane %v980_v27, 0  ;;  %v126_v29 = vperm.slane %v980_v27, 1 }
  0x6d   :  { %v1162_v6 = vpop.permute.xlu2 %217 }
  0x74   :  { %v268_v7 = vpop.permute.xlu1 %267  ;;  %v284_v8 = vpop.permute.xlu0 %283 }
  0x75   :  { %v154_v24 = vpop.permute.xlu2 %153 }
  0x7c   :  { %v270_v16 = vpop.permute.xlu1 %269  ;;  %v286_v17 = vpop.permute.xlu0 %285 }
  0x7d   :  { %v271_v20 = vsel %vm137_vm0, %v268_v7, %v270_v16  ;;  %v272_v21 = vsel %vm137_vm0, %v270_v16, %v268_v7  ;;  %v287_v22 = vsel %vm155_vm1, %v284_v8, %v286_v17  ;;  %v288_v23 = vsel %vm155_vm1, %v286_v17, %v284_v8  ;;  %v134_v46 = vpop.permute.xlu2 %133 }
  0x7e   :  { %v295_v25 = vmul.f32 %v291_v13, %v287_v22  ;;  %v296_v26 = vmul.f32 %v292_v14, %v288_v23  ;;  %v279_v32 = vmul.f32 %v275_v18, %v271_v20  ;;  %v280_v33 = vmul.f32 %v276_v19, %v272_v21 }
  0x7f   :  { %v144_v13 = vperm.slane %v981_v9, 1  ;;  %v193_v14 = vperm.slane %v983_v10, 0 }
  0x80   :  { %387 = vmatpush.msra.mxu2 %v295_v25  ;;  %407 = vmatpush.msra.mxu3 %v296_v26 }
  0x82   :  { %388 = vmatpush.msra.mxu2 %v279_v32  ;;  %408 = vmatpush.msra.mxu3 %v280_v33 }
  0x84   :  { %v238_v38 = vpop.permute.xlu1 %237  ;;  %389 = vmatpush.msra.mxu2 %v263_v34  ;;  %409 = vmatpush.msra.mxu3 %v264_v35  ;;  %v236_v39 = vpop.permute.xlu0 %235 }
  0x85   :  { %v239_v40 = vsel %vm101_vm3, %v236_v39, %v238_v38  ;;  %v240_v41 = vsel %vm101_vm3, %v238_v38, %v236_v39  ;;  %v188_v62 = vpop.permute.xlu2 %187  ;;  %v175_v38 = vld [vmem:[%s1545_s1] sm:$0x3] }
  0x86   :  { %v247_v42 = vmul.f32 %v243_v36, %v239_v40  ;;  %v248_v43 = vmul.f32 %v244_v37, %v240_v41  ;;  %v979_v37 = vld [vmem:[%s1545_s1 + $0xa] sm:$0x3]  ;;  %v177_v41 = vperm.slane %v175_v38, 0 }
  0x87   :  { %v107_v39 = vperm.slane %v979_v37, 0  ;;  %v108_v40 = vperm.slane %v979_v37, 1 }
  0x88   :  { %390 = vmatpush.msra.mxu2 %v247_v42  ;;  %410 = vmatpush.msra.mxu3 %v248_v43  ;;  %v178_v42 = vperm.slane %v175_v38, 1 }
  0x8a   :  { %391 = vmatpush.msra.mxu2 %v1081_v0  ;;  %411 = vmatpush.msra.mxu3 %v1092_v1  ;;  %v210_v0 = vperm.slane %v984_v61, 1 }
  0x8c   :  { %v220_v51 = vpop.permute.xlu0 %219  ;;  %v152_v52 = vpop.permute.xlu1 %151 }
  0x8d   :  { %v221_v53 = vsel %vm81_vm4, %v1162_v6, %v220_v51  ;;  %v222_v54 = vsel %vm81_vm4, %v220_v51, %v1162_v6  ;;  %v156_v55 = vsel %vm155_vm1, %v152_v52, %v154_v24  ;;  %v157_v56 = vsel %vm155_vm1, %v154_v24, %v152_v52  ;;  %v170_v16 = vpop.permute.xlu2 %169 }
  0x8e   :  { %v165_v57 = vmul.f32 %v161_v47, %v156_v55  ;;  %v166_v58 = vmul.f32 %v162_v48, %v157_v56  ;;  %v229_v59 = vmul.f32 %v225_v49, %v222_v54  ;;  %v230_v60 = vmul.f32 %v226_v50, %v221_v53  ;;  %v299_v53 = vld [vmem:[%s1546_s2] sm:$0xff] }
  0x8f   :  { %v978_v54 = vld [vmem:[%s1545_s1 + $0x6] sm:$0x3] }
  0x90   :  { %347 = vmatpush.msra.mxu0 %v165_v57  ;;  %367 = vmatpush.msra.mxu1 %v166_v58  ;;  %v87_v56 = vperm.slane %v978_v54, 0  ;;  %v88_v57 = vperm.slane %v978_v54, 1 }
  0x91   :  { %392 = vmatpush.msra.mxu2 %v229_v59  ;;  %412 = vmatpush.msra.mxu3 %v230_v60 }
  0x94   :  { %v202_v1 = vpop.permute.xlu0 %201  ;;  %v204_v4 = vpop.permute.xlu1 %203 }
  0x95   :  { %v205_v5 = vsel %vm63_vm5, %v202_v1, %v204_v4  ;;  %v206_v6 = vsel %vm63_vm5, %v204_v4, %v202_v1  ;;  %v100_v36 = vpop.permute.xlu2 %99 }
  0x96   :  { %v213_v7 = vmul.f32 %v209_v63, %v206_v6  ;;  %v214_v8 = vmul.f32 %v210_v0, %v205_v5  ;;  %v977_v0 = vld [vmem:[%s1545_s1 + $0x4] sm:$0x3] }
  0x97   :  { %v69_v1 = vperm.slane %v977_v0, 0  ;;  %v70_v4 = vperm.slane %v977_v0, 1 }
  0x98   :  { %393 = vmatpush.msra.mxu2 %v213_v7  ;;  %413 = vmatpush.msra.mxu3 %v214_v8 }
  0x9c   :  { %v136_v17 = vpop.permute.xlu0 %135  ;;  %v186_v18 = vpop.permute.xlu1 %185 }
  0x9d   :  { %v138_v19 = vsel %vm137_vm0, %v134_v46, %v136_v17  ;;  %v139_v20 = vsel %vm137_vm0, %v136_v17, %v134_v46  ;;  %v189_v21 = vsel %vm45_vm6, %v186_v18, %v188_v62  ;;  %v190_v22 = vsel %vm45_vm6, %v188_v62, %v186_v18  ;;  %v60_v55 = vpop.permute.xlu2 %59 }
  0x9e   :  { %v147_v23 = vmul.f32 %v143_v12, %v138_v19  ;;  %v148_v24 = vmul.f32 %v144_v13, %v139_v20  ;;  %v197_v25 = vmul.f32 %v193_v14, %v190_v22  ;;  %v198_v26 = vmul.f32 %v194_v15, %v189_v21 }
  0xa0   :  { %348 = vmatpush.msra.mxu0 %v147_v23  ;;  %368 = vmatpush.msra.mxu1 %v148_v24 }
  0xa1   :  { %394 = vmatpush.msra.mxu2 %v197_v25  ;;  %414 = vmatpush.msra.mxu3 %v198_v26 }
  0xa4   :  { %v116_v30 = vpop.permute.xlu0 %115  ;;  %v118_v31 = vpop.permute.xlu1 %117 }
  0xa5   :  { %v120_v32 = vsel %vm119_vm2, %v116_v30, %v118_v31  ;;  %v121_v33 = vsel %vm119_vm2, %v118_v31, %v116_v30 }
  0xa6   :  { %v129_v34 = vmul.f32 %v125_v28, %v120_v32  ;;  %v130_v35 = vmul.f32 %v126_v29, %v121_v33 }
  0xa8   :  { %349 = vmatpush.msra.mxu0 %v129_v34  ;;  %369 = vmatpush.msra.mxu1 %v130_v35 }
  0xac   :  { %v172_v43 = vpop.permute.xlu0 %171  ;;  %v98_v44 = vpop.permute.xlu1 %97 }
  0xad   :  { %v173_v45 = vsel %vm28_vm7, %v170_v16, %v172_v43  ;;  %v174_v46 = vsel %vm28_vm7, %v172_v43, %v170_v16  ;;  %v102_v47 = vsel %vm101_vm3, %v98_v44, %v100_v36  ;;  %v103_v48 = vsel %vm101_vm3, %v100_v36, %v98_v44  ;;  %v31_v16 = vld [vmem:[%s1545_s1] sm:$0x3] }
  0xae   :  { %v111_v49 = vmul.f32 %v107_v39, %v102_v47  ;;  %v112_v50 = vmul.f32 %v108_v40, %v103_v48  ;;  %v181_v51 = vmul.f32 %v177_v41, %v174_v46  ;;  %v182_v52 = vmul.f32 %v178_v42, %v173_v45  ;;  %v994_v48 = vld [vmem:[%s1547_s3 + $0x8] sm:$0xff] }
  0xaf   :  { %v33_v19 = vperm.slane %v31_v16, 0  ;;  %v34_v20 = vperm.slane %v31_v16, 1  ;;  %v1052_v47 = vmov 0  }
  0xb0   :  { %350 = vmatpush.msra.mxu0 %v111_v49  ;;  %370 = vmatpush.msra.mxu1 %v112_v50 }
  0xb1   :  { %395 = vmatpush.msra.mxu2 %v181_v51  ;;  %415 = vmatpush.msra.mxu3 %v182_v52 }
  0xb2   :  { %992 = vmatmul.msk.f32.vlgmr.msra.gmra.mxu2 %vm336_vm8, %v299_v53  ;;  %993 = vmatmul.msk.f32.vlgmr.msra.gmra.mxu3 %vm336_vm8, %v299_v53 }
  0xb3   :  { %351 = vmatpush.msra.mxu0 %v1109_v2  ;;  %371 = vmatpush.msra.mxu1 %v1118_v3  ;;  %v976_v2 = vld [vmem:[%s1545_s1 + $0x2] sm:$0x3]  ;;  %v44_v3 = vpop.permute.xlu2 %43 }
  0xb4   :  { %v78_v58 = vpop.permute.xlu0 %77  ;;  %v80_v59 = vpop.permute.xlu1 %79  ;;  %v51_v7 = vperm.slane %v976_v2, 0  ;;  %v52_v8 = vperm.slane %v976_v2, 1  ;;  %1029 = vset.pattern.permute.xlu0 %v1052_v47  ;;  %1031 = vset.pattern.permute.xlu2 %v1052_v47 }
  0xb5   :  { %v82_v60 = vsel %vm81_vm4, %v78_v58, %v80_v59  ;;  %v83_v61 = vsel %vm81_vm4, %v80_v59, %v78_v58  ;;  %1030 = vset.pattern.permute.xlu1 %v1052_v47 }
  0xb6   :  { %v91_v62 = vmul.f32 %v87_v56, %v83_v61  ;;  %v92_v63 = vmul.f32 %v88_v57, %v82_v60  ;;  %v420_v60 = vld [vmem:[%s1547_s3] sm:$0xff] }
  0xb8   :  { %352 = vmatpush.msra.mxu0 %v91_v62  ;;  %372 = vmatpush.msra.mxu1 %v92_v63 }
  0xbc   :  { %v62_v5 = vpop.permute.xlu0 %61  ;;  %v42_v6 = vpop.permute.xlu1 %41 }
  0xbd   :  { %v64_v9 = vsel %vm63_vm5, %v60_v55, %v62_v5  ;;  %v65_v10 = vsel %vm63_vm5, %v62_v5, %v60_v55  ;;  %v46_v12 = vsel %vm45_vm6, %v42_v6, %v44_v3  ;;  %v47_v13 = vsel %vm45_vm6, %v44_v3, %v42_v6 }
  0xbe   :  { %v73_v14 = vmul.f32 %v69_v1, %v65_v10  ;;  %v74_v15 = vmul.f32 %v70_v4, %v64_v9  ;;  %v55_v17 = vmul.f32 %v51_v7, %v47_v13  ;;  %v56_v18 = vmul.f32 %v52_v8, %v46_v12 }
  0xc0   :  { %353 = vmatpush.msra.mxu0 %v73_v14  ;;  %373 = vmatpush.msra.mxu1 %v74_v15 }
  0xc2   :  { %354 = vmatpush.msra.mxu0 %v55_v17  ;;  %374 = vmatpush.msra.mxu1 %v56_v18 }
  0xc4   :  { %v23_v21 = vpop.permute.xlu0 %22  ;;  %v25_v22 = vpop.permute.xlu1 %24 }
  0xc5   :  { %v29_v23 = vsel %vm28_vm7, %v23_v21, %v25_v22  ;;  %v30_v24 = vsel %vm28_vm7, %v25_v22, %v23_v21 }
  0xc6   :  { %v37_v25 = vmul.f32 %v33_v19, %v30_v24  ;;  %v38_v26 = vmul.f32 %v34_v20, %v29_v23 }
  0xc8   :  { %355 = vmatpush.msra.mxu0 %v37_v25  ;;  %375 = vmatpush.msra.mxu1 %v38_v26 }
  0xc9   :  { %990 = vmatmul.msk.f32.vlgmr.msra.gmra.mxu0 %vm336_vm8, %v299_v53  ;;  %991 = vmatmul.msk.f32.vlgmr.msra.gmra.mxu1 %vm336_vm8, %v299_v53 }
 0x135   :  { %v397_v27 = vpop.f32.mrf.mxu2  ;;  %v417_v28 = vpop.f32.mrf.mxu3 }
 0x136   :  { %v463_v29 = vadd.f32 %v417_v28, %v397_v27 }
 0x138   :  { %464 = vadd.xlane.f32.xlu2 %v463_v29 }
 0x146   :  { %v357_v30 = vpop.f32.mrf.mxu0  ;;  %v377_v31 = vpop.f32.mrf.mxu1 }
 0x147   :  { %v423_v32 = vadd.f32 %v377_v31, %v357_v30 }
 0x149   :  { %424 = vadd.xlane.f32.xlu0 %v423_v32 }
 0x15d   :  { %456 = vperm.xlu0 %1029, %v994_v48  }
 0x1ab   :  { %v465_v33 = vpop.xlane.xlu2 %464 }
 0x1ac   :  { %v466_v34 = vmul.f32 0.00390625, %v465_v33 }
 0x1ae   :  { %v1299_v35 = vsub.f32 %v397_v27, %v466_v34  ;;  %v1301_v36 = vsub.f32 %v417_v28, %v466_v34  ;;  %v1001_v27 = vld [vmem:[%s1545_s1 + $0x10] sm:$0x3]  ;;  %v1000_v28 = vld [vmem:[%s1545_s1 + $0xe] sm:$0x3] }
 0x1af   :  { %v620_v29 = vperm.slane %v1001_v27, 0  ;;  %v604_v34 = vperm.slane %v1000_v28, 0 }
 0x1b0   :  { %v469_v37 = vmul.f32 %v1299_v35, %v1299_v35  ;;  %v470_v38 = vmul.f32 %v1301_v36, %v1301_v36 }
 0x1b2   :  { %v471_v39 = vadd.f32 %v470_v38, %v469_v37 }
 0x1b4   :  { %472 = vadd.xlane.f32.xlu1 %v471_v39 }
 0x1bc   :  { %v425_v40 = vpop.xlane.xlu0 %424 }
 0x1bd   :  { %v426_v41 = vmul.f32 0.00390625, %v425_v40 }
 0x1bf   :  { %v427_v42 = vsub.f32 %v357_v30, %v426_v41  ;;  %v428_v43 = vsub.f32 %v377_v31, %v426_v41  ;;  %v621_v30 = vperm.slane %v1001_v27, 1  ;;  %v1007_v27 = vld [vmem:[%s1545_s1 + $0xe] sm:$0x3] }
 0x1c1   :  { %v429_v44 = vmul.f32 %v427_v42, %v427_v42  ;;  %v430_v45 = vmul.f32 %v428_v43, %v428_v43 }
 0x1c3   :  { %v431_v46 = vadd.f32 %v430_v45, %v429_v44  ;;  %v998_v45 = vld [vmem:[%s1545_s1 + $0xa] sm:$0x3] }
 0x1c5   :  { %432 = vadd.xlane.f32.xlu2 %v431_v46 }
 0x1cf   :  { %v457_v12 = vpop.permute.xlu0 %456 }
 0x227   :  { %v473_v49 = vpop.xlane.xlu1 %472 }
 0x228   :  { %v474_v50 = vmul.f32 0.00390625, %v473_v49 }
 0x22a   :  { %v475_v51 = vadd.f32 1e-05, %v474_v50 }
 0x22c   :  { %1032 = vrsqrt.f32 %v475_v51  ;;  %vm482_vm10 = vweird.f32 %v475_v51 }
 0x232   :  { %v1033_v52 = vpop.eup %1032 }
 0x233   :  { %v477_v53 = vmul.f32 %v1033_v52, %v475_v51  ;;  %vm483_vm9 = vweird.f32 %v1033_v52  ;;  %v572_v51 = vperm.slane %v998_v45, 0 }
 0x234   :  { %vm484_vm11 = vmor %vm482_vm10, %vm483_vm9 }
 0x235   :  { %v478_v54 = vmul.f32 %v1033_v52, %v477_v53 }
 0x237   :  { %v479_v55 = vmul.f32 0.5, %v478_v54 }
 0x238   :  { %v433_v56 = vpop.xlane.xlu2 %432 }
 0x239   :  { %v480_v57 = vsub.f32 1.5, %v479_v55  ;;  %v434_v58 = vmul.f32 0.00390625, %v433_v56 }
 0x23b   :  { %v435_v59 = vadd.f32 1e-05, %v434_v58  ;;  %v481_v61 = vmul.f32 %v1033_v52, %v480_v57 }
 0x23d   :  { %1034 = vrsqrt.f32 %v435_v59  ;;  %v485_v62 = vsel %vm484_vm11, %v1033_v52, %v481_v61  ;;  %vm442_vm13 = vweird.f32 %v435_v59  ;;  %v573_v52 = vperm.slane %v998_v45, 1 }
 0x23e   :  { %v486_v63 = vmul.f32 %v485_v62, %v420_v60 }
 0x240   :  { %489 = vperm.xlu2 %1031, %v486_v63  }
 0x243   :  { %v1035_v0 = vpop.eup %1034 }
 0x244   :  { %v437_v2 = vmul.f32 %v1035_v0, %v435_v59  ;;  %vm443_vm12 = vweird.f32 %v1035_v0  ;;  %v997_v59 = vld [vmem:[%s1545_s1 + $0x6] sm:$0x3] }
 0x245   :  { %vm444_vm14 = vmor %vm442_vm13, %vm443_vm12  ;;  %v554_v62 = vperm.slane %v997_v59, 0  ;;  %v555_v63 = vperm.slane %v997_v59, 1 }
 0x246   :  { %v438_v3 = vmul.f32 %v1035_v0, %v437_v2 }
 0x248   :  { %v439_v1 = vmul.f32 0.5, %v438_v3 }
 0x24a   :  { %v440_v4 = vsub.f32 1.5, %v439_v1 }
 0x24c   :  { %v441_v5 = vmul.f32 %v1035_v0, %v440_v4 }
 0x24e   :  { %v445_v6 = vsel %vm444_vm14, %v1035_v0, %v441_v5 }
 0x24f   :  { %v446_v7 = vmul.f32 %v445_v6, %v420_v60 }
 0x251   :  { %449 = vperm.xlu1 %1030, %v446_v7   ;;  %v996_v7 = vld [vmem:[%s1545_s1 + $0x4] sm:$0x3] }
 0x29a   :  { %v490_v17 = vpop.permute.xlu2 %489 }
 0x29b   :  { %v493_v18 = vmul.f32 %v490_v17, %v1301_v36  ;;  %v492_v21 = vmul.f32 %v490_v17, %v1299_v35  ;;  %v605_v35 = vperm.slane %v1000_v28, 1  ;;  %v734_v28 = vperm.slane %v1007_v27, 0 }
 0x29d   :  { %v495_v19 = vadd.f32 %v493_v18, %v457_v12  ;;  %v494_v22 = vadd.f32 %v492_v21, %v457_v12 }
 0x29f   :  { %v1336_v20 = vmax.f32 %v495_v19, 0.0  ;;  %v1351_v23 = vmax.f32 %v494_v22, 0.0 }
 0x2c3   :  { %v450_v8 = vpop.permute.xlu1 %449 }
 0x2c4   :  { %v452_v9 = vmul.f32 %v450_v8, %v427_v42  ;;  %v453_v10 = vmul.f32 %v450_v8, %v428_v43  ;;  %v999_v42 = vld [vmem:[%s1545_s1 + $0xc] sm:$0x3]  ;;  %v1008_v8 = vld [vmem:[%s1545_s1 + $0x10] sm:$0x3] }
 0x2c5   :  { %v588_v46 = vperm.slane %v999_v42, 0  ;;  %v589_v47 = vperm.slane %v999_v42, 1 }
 0x2c6   :  { %v459_v13 = vadd.f32 %v457_v12, %v452_v9  ;;  %v460_v14 = vadd.f32 %v457_v12, %v453_v10  ;;  %v538_v9 = vperm.slane %v996_v7, 0  ;;  %v539_v10 = vperm.slane %v996_v7, 1 }
 0x2c7   :  { %v750_v12 = vperm.slane %v1008_v8, 0 }
 0x2c8   :  { %v1313_v15 = vmax.f32 %v459_v13, 0.0  ;;  %v1315_v16 = vmax.f32 %v460_v14, 0.0  ;;  %v751_v13 = vperm.slane %v1008_v8, 1  ;;  %v995_v8 = vld [vmem:[%s1545_s1 + $0x2] sm:$0x3] }
 0x2ca   :  { %598 = vrot.lane.b32.xlu0 %v1315_v16, %s1044_s17  ;;  %614 = vrot.lane.b32.xlu2 %v1315_v16, %s1045_s18 }
 0x2cb   :  { %612 = vrot.lane.b32.xlu1 %v1313_v15, %s1045_s18 }
 0x2d2   :  { %566 = vrot.lane.b32.xlu0 %v1315_v16, %s1047_s22  ;;  %596 = vrot.lane.b32.xlu2 %v1313_v15, %s1044_s17 }
 0x2d3   :  { %580 = vrot.lane.b32.xlu1 %v1313_v15, %s1046_s19 }
 0x2da   :  { %548 = vrot.lane.b32.xlu0 %v1315_v16, %s1048_s23  ;;  %582 = vrot.lane.b32.xlu2 %v1315_v16, %s1046_s19 }
 0x2db   :  { %532 = vrot.lane.b32.xlu1 %v1315_v16, %s1049_s28 }
 0x2e2   :  { %530 = vrot.lane.b32.xlu0 %v1313_v15, %s1049_s28  ;;  %564 = vrot.lane.b32.xlu2 %v1313_v15, %s1047_s22 }
 0x2e3   :  { %744 = vrot.lane.b32.xlu1 %v1336_v20, %s1045_s18 }
 0x2ea   :  { %712 = vrot.lane.b32.xlu0 %v1336_v20, %s1046_s19  ;;  %546 = vrot.lane.b32.xlu2 %v1313_v15, %s1048_s23 }
 0x2eb   :  { %728 = vrot.lane.b32.xlu1 %v1336_v20, %s1044_s17 }
 0x2f2   :  { %694 = vrot.lane.b32.xlu0 %v1351_v23, %s1047_s22  ;;  %514 = vrot.lane.b32.xlu2 %v1313_v15, %s1050_s29 }
 0x2f3   :  { %696 = vrot.lane.b32.xlu1 %v1336_v20, %s1047_s22 }
 0x2fa   :  { %676 = vrot.lane.b32.xlu0 %v1351_v23, %s1048_s23  ;;  %742 = vrot.lane.b32.xlu2 %v1351_v23, %s1045_s18 }
 0x2fb   :  { %678 = vrot.lane.b32.xlu1 %v1336_v20, %s1048_s23 }
 0x302   :  { %644 = vrot.lane.b32.xlu0 %v1351_v23, %s1050_s29  ;;  %726 = vrot.lane.b32.xlu2 %v1351_v23, %s1044_s17 }
 0x303   :  { %660 = vrot.lane.b32.xlu1 %v1351_v23, %s1049_s28 }
 0x30a   :  { %516 = vrot.lane.b32.xlu0 %v1315_v16, %s1050_s29  ;;  %710 = vrot.lane.b32.xlu2 %v1351_v23, %s1046_s19 }
 0x30b   :  { %646 = vrot.lane.b32.xlu1 %v1336_v20, %s1050_s29 }
 0x312   :  { %662 = vrot.lane.b32.xlu2 %v1336_v20, %s1049_s28 }
 0x313   :  { %628 = vrot.lane.b32.xlu1 %v1351_v23, %s1051_s30 }
 0x31a   :  { %630 = vrot.lane.b32.xlu2 %v1336_v20, %s1051_s30 }
 0x31b   :  { %498 = vrot.lane.b32.xlu1 %v1313_v15, %s1051_s30 }
 0x322   :  { %500 = vrot.lane.b32.xlu2 %v1315_v16, %s1051_s30 }
 0x324   :  { %v615_v24 = vpop.permute.xlu2 %614 }
 0x32c   :  { %v597_v25 = vpop.permute.xlu2 %596 }
 0x334   :  { %v583_v26 = vpop.permute.xlu2 %582 }
 0x33c   :  { %v599_v31 = vpop.permute.xlu0 %598  ;;  %v565_v32 = vpop.permute.xlu2 %564 }
 0x33d   :  { %v613_v33 = vpop.permute.xlu1 %612  ;;  %v600_v36 = vsel %vm137_vm0, %v597_v25, %v599_v31  ;;  %v601_v37 = vsel %vm137_vm0, %v599_v31, %v597_v25 }
 0x33e   :  { %v616_v38 = vsel %vm155_vm1, %v613_v33, %v615_v24  ;;  %v617_v39 = vsel %vm155_vm1, %v615_v24, %v613_v33  ;;  %v608_v43 = vmul.f32 %v604_v34, %v600_v36  ;;  %v609_v44 = vmul.f32 %v605_v35, %v601_v37  ;;  %v1006_v37 = vld [vmem:[%s1545_s1 + $0xc] sm:$0x3] }
 0x33f   :  { %v624_v40 = vmul.f32 %v620_v29, %v616_v38  ;;  %v625_v41 = vmul.f32 %v621_v30, %v617_v39  ;;  %v735_v29 = vperm.slane %v1007_v27, 1  ;;  %v1005_v38 = vld [vmem:[%s1545_s1 + $0xa] sm:$0x3]  ;;  %v718_v39 = vperm.slane %v1006_v37, 0  ;;  %v634_v27 = vld [vmem:[%s1545_s1] sm:$0x3] }
 0x341   :  { %806 = vmatpush.msrb.mxu0 %v624_v40  ;;  %826 = vmatpush.msrb.mxu1 %v625_v41  ;;  %v719_v40 = vperm.slane %v1006_v37, 1 }
 0x343   :  { %807 = vmatpush.msrb.mxu0 %v608_v43  ;;  %827 = vmatpush.msrb.mxu1 %v609_v44  ;;  %v702_v43 = vperm.slane %v1005_v38, 0  ;;  %v703_v44 = vperm.slane %v1005_v38, 1 }
 0x344   :  { %v567_v48 = vpop.permute.xlu0 %566  ;;  %v547_v49 = vpop.permute.xlu2 %546 }
 0x345   :  { %v581_v50 = vpop.permute.xlu1 %580  ;;  %v568_v53 = vsel %vm101_vm3, %v565_v32, %v567_v48  ;;  %v569_v54 = vsel %vm101_vm3, %v567_v48, %v565_v32 }
 0x346   :  { %v584_v55 = vsel %vm119_vm2, %v581_v50, %v583_v26  ;;  %v585_v56 = vsel %vm119_vm2, %v583_v26, %v581_v50  ;;  %v576_v60 = vmul.f32 %v572_v51, %v568_v53  ;;  %v577_v61 = vmul.f32 %v573_v52, %v569_v54  ;;  %v1004_v54 = vld [vmem:[%s1545_s1 + $0x6] sm:$0x3] }
 0x347   :  { %v592_v57 = vmul.f32 %v588_v46, %v584_v55  ;;  %v593_v58 = vmul.f32 %v589_v47, %v585_v56  ;;  %v684_v55 = vperm.slane %v1004_v54, 0  ;;  %v685_v56 = vperm.slane %v1004_v54, 1 }
 0x349   :  { %808 = vmatpush.msrb.mxu0 %v592_v57  ;;  %828 = vmatpush.msrb.mxu1 %v593_v58 }
 0x34b   :  { %809 = vmatpush.msrb.mxu0 %v576_v60  ;;  %829 = vmatpush.msrb.mxu1 %v577_v61 }
 0x34c   :  { %v549_v0 = vpop.permute.xlu0 %548  ;;  %v1418_v2 = vpop.permute.xlu2 %514 }
 0x34d   :  { %v550_v3 = vsel %vm81_vm4, %v547_v49, %v549_v0  ;;  %v551_v1 = vsel %vm81_vm4, %v549_v0, %v547_v49  ;;  %810 = vmatpush.msrb.mxu0 %v1313_v15  ;;  %830 = vmatpush.msrb.mxu1 %v1315_v16  ;;  %v533_v4 = vpop.permute.xlu1 %532 }
 0x34e   :  { %v558_v5 = vmul.f32 %v554_v62, %v551_v1  ;;  %v559_v6 = vmul.f32 %v555_v63, %v550_v3  ;;  %v1003_v63 = vld [vmem:[%s1545_s1 + $0x4] sm:$0x3] }
 0x34f   :  { %v668_v0 = vperm.slane %v1003_v63, 0  ;;  %v669_v3 = vperm.slane %v1003_v63, 1 }
 0x350   :  { %811 = vmatpush.msrb.mxu0 %v558_v5  ;;  %831 = vmatpush.msrb.mxu1 %v559_v6 }
 0x354   :  { %v531_v14 = vpop.permute.xlu0 %530  ;;  %v743_v15 = vpop.permute.xlu2 %742 }
 0x355   :  { %v534_v16 = vsel %vm63_vm5, %v531_v14, %v533_v4  ;;  %v535_v17 = vsel %vm63_vm5, %v533_v4, %v531_v14  ;;  %v745_v18 = vpop.permute.xlu1 %744 }
 0x356   :  { %v746_v19 = vsel %vm155_vm1, %v743_v15, %v745_v18  ;;  %v747_v21 = vsel %vm155_vm1, %v745_v18, %v743_v15  ;;  %v542_v22 = vmul.f32 %v538_v9, %v535_v17  ;;  %v543_v24 = vmul.f32 %v539_v10, %v534_v16  ;;  %v1002_v9 = vld [vmem:[%s1545_s1 + $0x2] sm:$0x3] }
 0x357   :  { %v754_v25 = vmul.f32 %v750_v12, %v746_v19  ;;  %v755_v26 = vmul.f32 %v751_v13, %v747_v21  ;;  %v522_v10 = vperm.slane %v995_v8, 0  ;;  %v523_v12 = vperm.slane %v995_v8, 1 }
 0x358   :  { %812 = vmatpush.msrb.mxu0 %v542_v22  ;;  %832 = vmatpush.msrb.mxu1 %v543_v24  ;;  %v652_v13 = vperm.slane %v1002_v9, 0  ;;  %v653_v14 = vperm.slane %v1002_v9, 1 }
 0x359   :  { %846 = vmatpush.msrb.mxu2 %v754_v25  ;;  %866 = vmatpush.msrb.mxu3 %v755_v26 }
 0x35c   :  { %v713_v30 = vpop.permute.xlu0 %712  ;;  %v727_v31 = vpop.permute.xlu2 %726 }
 0x35d   :  { %v729_v32 = vpop.permute.xlu1 %728 }
 0x35e   :  { %v730_v33 = vsel %vm137_vm0, %v727_v31, %v729_v32  ;;  %v731_v34 = vsel %vm137_vm0, %v729_v32, %v727_v31 }
 0x35f   :  { %v738_v35 = vmul.f32 %v734_v28, %v730_v33  ;;  %v739_v36 = vmul.f32 %v735_v29, %v731_v34  ;;  %v636_v28 = vperm.slane %v634_v27, 0  ;;  %v637_v29 = vperm.slane %v634_v27, 1 }
 0x361   :  { %847 = vmatpush.msrb.mxu2 %v738_v35  ;;  %867 = vmatpush.msrb.mxu3 %v739_v36  ;;  %v1009_v35 = vld [vmem:[%s1546_s2 + $0x8] sm:$0xff]  ;;  %v504_v36 = vld [vmem:[%s1545_s1] sm:$0x3] }
 0x362   :  { %v506_v37 = vperm.slane %v504_v36, 0  ;;  %v507_v38 = vperm.slane %v504_v36, 1 }
 0x364   :  { %v695_v41 = vpop.permute.xlu0 %694  ;;  %v711_v42 = vpop.permute.xlu2 %710 }
 0x365   :  { %v714_v45 = vsel %vm119_vm2, %v711_v42, %v713_v30  ;;  %v715_v46 = vsel %vm119_vm2, %v713_v30, %v711_v42  ;;  %v697_v47 = vpop.permute.xlu1 %696 }
 0x366   :  { %v698_v48 = vsel %vm101_vm3, %v695_v41, %v697_v47  ;;  %v699_v49 = vsel %vm101_vm3, %v697_v47, %v695_v41  ;;  %v722_v50 = vmul.f32 %v718_v39, %v714_v45  ;;  %v723_v51 = vmul.f32 %v719_v40, %v715_v46 }
 0x367   :  { %v706_v52 = vmul.f32 %v702_v43, %v698_v48  ;;  %v707_v53 = vmul.f32 %v703_v44, %v699_v49 }
 0x368   :  { %848 = vmatpush.msrb.mxu2 %v722_v50  ;;  %868 = vmatpush.msrb.mxu3 %v723_v51 }
 0x36a   :  { %849 = vmatpush.msrb.mxu2 %v706_v52  ;;  %869 = vmatpush.msrb.mxu3 %v707_v53 }
 0x36c   :  { %v677_v57 = vpop.permute.xlu0 %676  ;;  %850 = vmatpush.msrb.mxu2 %v1351_v23  ;;  %870 = vmatpush.msrb.mxu3 %v1336_v20  ;;  %v663_v1 = vpop.permute.xlu2 %662 }
 0x36d   :  { %v679_v58 = vpop.permute.xlu1 %678 }
 0x36e   :  { %v680_v59 = vsel %vm81_vm4, %v677_v57, %v679_v58  ;;  %v681_v60 = vsel %vm81_vm4, %v679_v58, %v677_v57 }
 0x36f   :  { %v688_v61 = vmul.f32 %v684_v55, %v681_v60  ;;  %v689_v62 = vmul.f32 %v685_v56, %v680_v59 }
 0x371   :  { %851 = vmatpush.msrb.mxu2 %v688_v61  ;;  %871 = vmatpush.msrb.mxu3 %v689_v62 }
 0x374   :  { %v645_v23 = vpop.permute.xlu0 %644 }
 0x375   :  { %v661_v20 = vpop.permute.xlu1 %660 }
 0x376   :  { %v664_v4 = vsel %vm63_vm5, %v661_v20, %v663_v1  ;;  %v665_v5 = vsel %vm63_vm5, %v663_v1, %v661_v20 }
 0x377   :  { %v672_v6 = vmul.f32 %v668_v0, %v665_v5  ;;  %v673_v7 = vmul.f32 %v669_v3, %v664_v4  ;;  %v1015_v0 = vld [vmem:[%s1547_s3 + $0x18] sm:$0xff] }
 0x379   :  { %852 = vmatpush.msrb.mxu2 %v672_v6  ;;  %872 = vmatpush.msrb.mxu3 %v673_v7 }
 0x37c   :  { %v517_v15 = vpop.permute.xlu0 %516 }
 0x37d   :  { %v518_v16 = vsel %vm45_vm6, %v1418_v2, %v517_v15  ;;  %v519_v17 = vsel %vm45_vm6, %v517_v15, %v1418_v2  ;;  %v647_v18 = vpop.permute.xlu1 %646  ;;  %v631_v2 = vpop.permute.xlu2 %630 }
 0x37e   :  { %v648_v19 = vsel %vm45_vm6, %v645_v23, %v647_v18  ;;  %v649_v21 = vsel %vm45_vm6, %v647_v18, %v645_v23  ;;  %v526_v22 = vmul.f32 %v522_v10, %v519_v17  ;;  %v527_v24 = vmul.f32 %v523_v12, %v518_v16  ;;  %v1016_v17 = vld [vmem:[%s1547_s3 + $0x10] sm:$0xff] }
 0x37f   :  { %v656_v25 = vmul.f32 %v652_v13, %v649_v21  ;;  %v657_v26 = vmul.f32 %v653_v14, %v648_v19 }
 0x380   :  { %813 = vmatpush.msrb.mxu0 %v526_v22  ;;  %833 = vmatpush.msrb.mxu1 %v527_v24 }
 0x381   :  { %853 = vmatpush.msrb.mxu2 %v656_v25  ;;  %873 = vmatpush.msrb.mxu3 %v657_v26 }
 0x385   :  { %v629_v30 = vpop.permute.xlu1 %628  ;;  %v501_v39 = vpop.permute.xlu2 %500 }
 0x386   :  { %v632_v31 = vsel %vm28_vm7, %v629_v30, %v631_v2  ;;  %v633_v32 = vsel %vm28_vm7, %v631_v2, %v629_v30 }
 0x387   :  { %v640_v33 = vmul.f32 %v636_v28, %v633_v32  ;;  %v641_v34 = vmul.f32 %v637_v29, %v632_v31  ;;  %v1040_v32 = vld [vmem:[%s1544_s0] sm:$0xff] }
 0x389   :  { %854 = vmatpush.msrb.mxu2 %v640_v33  ;;  %874 = vmatpush.msrb.mxu3 %v641_v34  ;;  %v1041_v34 = vld [vmem:[%s1544_s0 + $0x8] sm:$0xff] }
 0x38a   :  { %1012 = vmatmul.msk.f32.vlgmr.msrb.gmra.mxu2 %vm336_vm8, %v1009_v35  ;;  %1013 = vmatmul.msk.f32.vlgmr.msrb.gmra.mxu3 %vm336_vm8, %v1009_v35 }
 0x38d   :  { %v499_v40 = vpop.permute.xlu1 %498 }
 0x38e   :  { %v502_v41 = vsel %vm28_vm7, %v499_v40, %v501_v39  ;;  %v503_v42 = vsel %vm28_vm7, %v501_v39, %v499_v40 }
 0x38f   :  { %v510_v43 = vmul.f32 %v506_v37, %v503_v42  ;;  %v511_v44 = vmul.f32 %v507_v38, %v502_v41  ;;  %v1042_v41 = vld [vmem:[%s1544_s0 + $0x10] sm:$0xff] }
 0x391   :  { %814 = vmatpush.msrb.mxu0 %v510_v43  ;;  %834 = vmatpush.msrb.mxu1 %v511_v44  ;;  %v1043_v43 = vld [vmem:[%s1544_s0 + $0x18] sm:$0xff] }
 0x392   :  { %1010 = vmatmul.msk.f32.vlgmr.msrb.gmra.mxu0 %vm336_vm8, %v1009_v35  ;;  %1011 = vmatmul.msk.f32.vlgmr.msrb.gmra.mxu1 %vm336_vm8, %v1009_v35 }
 0x40d   :  { %v856_v45 = vpop.f32.mrf.mxu2  ;;  %v876_v46 = vpop.f32.mrf.mxu3 }
 0x40e   :  { %v927_v47 = vadd.f32 %v876_v46, %v856_v45 }
 0x40f   :  { %v816_v48 = vpop.f32.mrf.mxu0  ;;  %v836_v49 = vpop.f32.mrf.mxu1 }
 0x410   :  { %v883_v50 = vadd.f32 %v836_v49, %v816_v48  ;;  %928 = vadd.xlane.f32.xlu1 %v927_v47 }
 0x412   :  { %884 = vadd.xlane.f32.xlu0 %v883_v50 }
 0x483   :  { %v929_v51 = vpop.xlane.xlu1 %928 }
 0x484   :  { %v930_v52 = vmul.f32 0.00390625, %v929_v51 }
 0x485   :  { %v885_v11 = vpop.xlane.xlu0 %884 }
 0x486   :  { %v931_v53 = vsub.f32 %v856_v45, %v930_v52  ;;  %v932_v54 = vsub.f32 %v876_v46, %v930_v52  ;;  %v886_v55 = vmul.f32 0.00390625, %v885_v11 }
 0x488   :  { %v887_v56 = vsub.f32 %v816_v48, %v886_v55  ;;  %v888_v57 = vsub.f32 %v836_v49, %v886_v55  ;;  %v933_v58 = vmul.f32 %v931_v53, %v931_v53  ;;  %v934_v59 = vmul.f32 %v932_v54, %v932_v54 }
 0x48a   :  { %v935_v60 = vadd.f32 %v934_v59, %v933_v58  ;;  %v889_v61 = vmul.f32 %v887_v56, %v887_v56  ;;  %v890_v62 = vmul.f32 %v888_v57, %v888_v57 }
 0x48c   :  { %936 = vadd.xlane.f32.xlu0 %v935_v60  ;;  %v891_v63 = vadd.f32 %v890_v62, %v889_v61 }
 0x48e   :  { %892 = vadd.xlane.f32.xlu2 %v891_v63 }
 0x4a6   :  { %916 = vperm.xlu2 %1031, %v1015_v0  }
 0x4ff   :  { %v937_v3 = vpop.xlane.xlu0 %936 }
 0x500   :  { %v938_v23 = vmul.f32 0.00390625, %v937_v3 }
 0x501   :  { %v893_v1 = vpop.xlane.xlu2 %892 }
 0x502   :  { %v939_v20 = vadd.f32 1e-05, %v938_v23  ;;  %v894_v4 = vmul.f32 0.00390625, %v893_v1 }
 0x504   :  { %1036 = vrsqrt.f32 %v939_v20  ;;  %v895_v5 = vadd.f32 1e-05, %v894_v4  ;;  %vm946_vm0 = vweird.f32 %v939_v20 }
 0x506   :  { %1038 = vrsqrt.f32 %v895_v5  ;;  %vm902_vm3 = vweird.f32 %v895_v5 }
 0x509   :  { %v917_v28 = vpop.permute.xlu2 %916 }
 0x50a   :  { %v1037_v6 = vpop.eup %1036 }
 0x50b   :  { %v941_v7 = vmul.f32 %v1037_v6, %v939_v20  ;;  %vm947_vm15 = vweird.f32 %v1037_v6 }
 0x50c   :  { %v1039_v8 = vpop.eup %1038  ;;  %vm948_vm2 = vmor %vm946_vm0, %vm947_vm15 }
 0x50d   :  { %v942_v9 = vmul.f32 %v1037_v6, %v941_v7  ;;  %v897_v10 = vmul.f32 %v1039_v8, %v895_v5  ;;  %vm903_vm1 = vweird.f32 %v1039_v8 }
 0x50e   :  { %vm904_vm4 = vmor %vm902_vm3, %vm903_vm1 }
 0x50f   :  { %v943_v12 = vmul.f32 0.5, %v942_v9  ;;  %v898_v13 = vmul.f32 %v1039_v8, %v897_v10 }
 0x511   :  { %v944_v14 = vsub.f32 1.5, %v943_v12  ;;  %v899_v15 = vmul.f32 0.5, %v898_v13 }
 0x513   :  { %v900_v16 = vsub.f32 1.5, %v899_v15  ;;  %v945_v18 = vmul.f32 %v1037_v6, %v944_v14 }
 0x515   :  { %v949_v19 = vsel %vm948_vm2, %v1037_v6, %v945_v18  ;;  %v901_v21 = vmul.f32 %v1039_v8, %v900_v16 }
 0x516   :  { %v950_v22 = vmul.f32 %v1016_v17, %v949_v19 }
 0x517   :  { %v905_v24 = vsel %vm904_vm4, %v1039_v8, %v901_v21 }
 0x518   :  { %953 = vperm.xlu0 %1029, %v950_v22   ;;  %v906_v25 = vmul.f32 %v1016_v17, %v905_v24 }
 0x51a   :  { %909 = vperm.xlu1 %1030, %v906_v25  }
 0x522   :  { %960 = vperm.xlu1 %1030, %v1015_v0  }
 0x58a   :  { %v954_v31 = vpop.permute.xlu0 %953 }
 0x58b   :  { %v956_v36 = vmul.f32 %v954_v31, %v931_v53  ;;  %v957_v37 = vmul.f32 %v954_v31, %v932_v54 }
 0x58c   :  { %v910_v26 = vpop.permute.xlu1 %909 }
 0x58d   :  { %v912_v27 = vmul.f32 %v910_v26, %v887_v56  ;;  %v913_v2 = vmul.f32 %v910_v26, %v888_v57 }
 0x58f   :  { %v919_v29 = vadd.f32 %v917_v28, %v912_v27  ;;  %v920_v30 = vadd.f32 %v917_v28, %v913_v2 }
 0x591   :  { %v921_v33 = vadd.f32 %v1040_v32, %v919_v29  ;;  %v922_v35 = vadd.f32 %v1041_v34, %v920_v30 }
 0x593   :  { %923 = vst [vmem:[%s1548_s4] sm:$0xff] %v921_v33 }
 0x594   :  { %924 = vst [vmem:[%s1548_s4 + $0x8] sm:$0xff] %v922_v35  ;;  %v961_v38 = vpop.permute.xlu1 %960 }
 0x595   :  { %v963_v39 = vadd.f32 %v961_v38, %v956_v36  ;;  %v964_v40 = vadd.f32 %v961_v38, %v957_v37 }
 0x597   :  { %v965_v42 = vadd.f32 %v1042_v41, %v963_v39  ;;  %v966_v44 = vadd.f32 %v1043_v43, %v964_v40 }
 0x599   :  { %1018 = vst [vmem:[%s1548_s4 + $0x10] sm:$0xff] %v965_v42 }
 0x59a   :  { %1019 = vst [vmem:[%s1548_s4 + $0x18] sm:$0xff] %v966_v44 }

</bundles_post_ra>
